<compile_context>
chip_gen: v7x
topology: tpu7x:2x2x1
jax: 0.10.0
libtpu: 0.0.40
codegen_flags: <defaults>
</compile_context>

<pallas_src>
import functools
import math

import jax
import jax.numpy as jnp
from jax.experimental import pallas as pl
from jax.experimental.pallas import tpu as pltpu

_NEG_SENTINEL = 10.0                       # reference: negative_dist[negative_dist == 0] = 10.0
_NEG_SENTINEL_SQ = _NEG_SENTINEL ** 2      # accumulation happens in squared-distance space


def _round_up(x, m):
    return ((x + m - 1) // m) * m


def _triplet_tile_kernel(row_meta_ref, col_meta_ref, emb_r_ref, emb_c_ref,
                         loss_ref, hp_acc, hn_acc, *, margin, batch):
    """One (tm, tn) tile of the pairwise squared-distance matrix.

    Grid axis 0 = row blocks ("parallel"), axis 1 = column blocks
    ("arbitrary", innermost reduction).  Running hardest-positive max /
    hardest-negative min live in (tm, 1) VMEM scratch in squared-distance
    space; sqrt happens once per row in the finalize branch.
    """
    i = pl.program_id(0)
    j = pl.program_id(1)
    tm = hp_acc.shape[0]
    tn = emb_c_ref.shape[0]

    @pl.when(j == 0)
    def _init():
        # hp init 0 reproduces the reference's "max includes 0 when a row has
        # no valid positive" quirk; hn init == sentinel matches the diagonal
        # always contributing a sentinel entry in the reference.
        hp_acc[...] = jnp.zeros_like(hp_acc)
        hn_acc[...] = jnp.full_like(hn_acc, _NEG_SENTINEL_SQ)

    # (tm, D) x (tn, D) contracted on D (NT matmul) on the MXU; operands may be
    # bf16, accumulation is f32.
    gram = jax.lax.dot_general(
        emb_r_ref[...], emb_c_ref[...],
        dimension_numbers=(((1,), (1,)), ((), ())),
        preferred_element_type=jnp.float32)               # (tm, tn) f32

    sq_row = row_meta_ref[:, 0:1]                         # (tm, 1) f32  ||a||^2
    lab_row = row_meta_ref[:, 1:2]                        # (tm, 1) f32  label
    sq_col = col_meta_ref[0:1, :]                         # (1, tn) f32  ||b||^2
    lab_col = col_meta_ref[1:2, :]                        # (1, tn) f32  label

    d2 = sq_row + sq_col - 2.0 * gram                     # squared distances (VPU, no sqrt here)

    labels_equal = lab_row == lab_col                     # (tm, tn)

    # Global row/col indices give the self-pair mask and the column-padding
    # validity directly from iota -- no extra DMA'd mask input.
    row_g = i * tm + jax.lax.broadcasted_iota(jnp.int32, (tm, tn), 0)
    col_g = j * tn + jax.lax.broadcasted_iota(jnp.int32, (tm, tn), 1)
    not_self = row_g != col_g
    col_valid = col_g < batch

    pos_cand = jnp.where(labels_equal & not_self & col_valid, d2, 0.0)
    neg_cand = jnp.where((~labels_equal) & col_valid & (d2 > 0.0),
                         d2, _NEG_SENTINEL_SQ)

    hp_acc[...] = jnp.maximum(hp_acc[...],
                              jnp.max(pos_cand, axis=1, keepdims=True))
    hn_acc[...] = jnp.minimum(hn_acc[...],
                              jnp.min(neg_cand, axis=1, keepdims=True))

    @pl.when(j == pl.num_programs(1) - 1)
    def _finalize():
        hp = jnp.sqrt(jnp.maximum(hp_acc[...], 0.0))      # ~2*B sqrts total, not B^2
        hn = jnp.sqrt(jnp.maximum(hn_acc[...], 0.0))
        loss_ref[...] = jnp.maximum(hp - hn + margin, 0.0)


@functools.partial(jax.jit,
                   static_argnames=("margin", "block_rows", "block_cols",
                                    "matmul_dtype"))
def online_triplet_loss(embeddings, labels, margin=1.0, block_rows=256,
                        block_cols=None, matmul_dtype=jnp.bfloat16):
    """embeddings: (B, D) float; labels: (B,) int -> scalar f32 mean loss."""
    B, D = embeddings.shape
    D_pad = _round_up(D, 128)
    itemsize = jnp.dtype(matmul_dtype).itemsize

    assert block_rows % 128 == 0, "block_rows must be a multiple of 128"
    assert block_cols is None or block_cols % 128 == 0

    # Row tile: shrink so the "parallel" row axis has >= 2 blocks (feeds both
    # v7x TensorCores) and small batches don't pay for a huge padded tile.
    tm = int(block_rows)
    while tm > 128 and _round_up(B, tm) < 2 * tm:
        tm //= 2

    if block_cols is None:
        B_pad = _round_up(B, tm)
        # Keep the whole column operand resident (single column step, one pass
        # over the embeddings) when it comfortably fits a v7x-safe VMEM budget;
        # otherwise tile columns like rows.
        col_bytes = B_pad * D_pad * itemsize
        tn = B_pad if (B_pad <= 2048 and col_bytes <= 8 * 1024 * 1024) else tm
    else:
        tn = int(block_cols)
        B_pad = _round_up(B, (tm * tn) // math.gcd(tm, tn))

    # f32 master copy for exact norms; MXU operands cast to `matmul_dtype`
    # (bf16 default). Norms / d2 / max-min stay in f32 per precision notes.
    emb_f32 = jnp.zeros((B_pad, D_pad), jnp.float32)
    emb_f32 = emb_f32.at[:B, :D].set(embeddings.astype(jnp.float32))
    emb_op = emb_f32.astype(matmul_dtype)

    sq = jnp.sum(emb_f32 * emb_f32, axis=1)                       # (B_pad,) f32
    # Labels ride along as f32 for the equality compare (exact for |label| < 2^24).
    lab_f = jnp.zeros((B_pad,), jnp.float32).at[:B].set(labels.astype(jnp.float32))
    row_meta = jnp.stack([sq, lab_f], axis=1)                     # (B_pad, 2)
    col_meta = jnp.stack([sq, lab_f], axis=0)                     # (2, B_pad)

    grid_rows = B_pad // tm
    grid_cols = B_pad // tn
    kernel = functools.partial(_triplet_tile_kernel,
                               margin=float(margin), batch=int(B))

    # Honest advisory cost: column operand is re-streamed once per row block
    # when column-tiled, once total when VMEM-resident.
    col_fetches = grid_rows if grid_cols > 1 else 1
    cost = pl.CostEstimate(
        flops=2 * B_pad * B_pad * D_pad + 10 * B_pad * B_pad,
        transcendentals=2 * B_pad,
        bytes_accessed=(B_pad * D_pad * itemsize
                        + col_fetches * B_pad * D_pad * itemsize
                        + 4 * B_pad * 4 + B_pad * 4),
    )

    losses = pl.pallas_call(
        kernel,
        out_shape=jax.ShapeDtypeStruct((B_pad, 1), jnp.float32),
        grid_spec=pltpu.PrefetchScalarGridSpec(
            num_scalar_prefetch=0,
            grid=(grid_rows, grid_cols),
            in_specs=[
                pl.BlockSpec((tm, 2), lambda i, j: (i, 0)),        # [||a||^2, label] rows
                pl.BlockSpec((2, tn), lambda i, j: (0, j)),        # [||b||^2, label] cols
                pl.BlockSpec((tm, D_pad), lambda i, j: (i, 0)),    # row embedding tile
                pl.BlockSpec((tn, D_pad), lambda i, j: (j, 0)),    # col embedding tile
                                                                   # (NT dot, no HBM transpose)
            ],
            out_specs=pl.BlockSpec((tm, 1), lambda i, j: (i, 0)),
            scratch_shapes=[pltpu.VMEM((tm, 1), jnp.float32),      # hardest-pos max (d^2)
                            pltpu.VMEM((tm, 1), jnp.float32)],     # hardest-neg min (d^2)
        ),
        compiler_params=pltpu.CompilerParams(
            dimension_semantics=("parallel", "arbitrary"),
            vmem_limit_bytes=48 * 1024 * 1024,                     # v7x-safe (64 MiB physical)
        ),
        cost_estimate=cost,
    )(row_meta, col_meta, emb_op, emb_op)

    return jnp.mean(losses[:B, 0])


def _reference_loss(embeddings, labels, margin=1.0):
    # Pure-JAX mirror of the PyTorch module (diff-and-sum cdist, exact f32).
    diff = embeddings[:, None, :] - embeddings[None, :, :]
    dist = jnp.sqrt(jnp.maximum(jnp.sum(diff * diff, axis=-1), 0.0))
    B = embeddings.shape[0]
    eye = jnp.eye(B, dtype=bool)
    labels_equal = labels[None, :] == labels[:, None]
    mask_ap = jnp.where(labels_equal & ~eye, 1.0, 0.0)
    mask_an = jnp.where(~labels_equal, 1.0, 0.0)
    hp = jnp.max(dist * mask_ap, axis=1)
    nd = dist * mask_an
    nd = jnp.where(nd == 0.0, 10.0, nd)
    hn = jnp.min(nd, axis=1)
    return jnp.mean(jnp.maximum(hp - hn + margin, 0.0))


def _matched_reference(embeddings, labels, margin=1.0, matmul_dtype=jnp.bfloat16):
    # Mirrors the kernel math (Gram form, matmul_dtype operands, f32 norms,
    # squared-space max/min) to tightly validate the kernel logic itself.
    emb = embeddings.astype(jnp.float32)
    sq = jnp.sum(emb * emb, axis=1)
    op = emb.astype(matmul_dtype)
    gram = jnp.dot(op, op.T, preferred_element_type=jnp.float32)
    d2 = sq[:, None] + sq[None, :] - 2.0 * gram
    B = emb.shape[0]
    eye = jnp.eye(B, dtype=bool)
    labels_equal = labels[None, :] == labels[:, None]
    pos = jnp.where(labels_equal & ~eye, d2, 0.0)
    neg = jnp.where((~labels_equal) & (d2 > 0.0), d2, _NEG_SENTINEL_SQ)
    hp = jnp.sqrt(jnp.maximum(jnp.max(pos, axis=1), 0.0))
    hn = jnp.sqrt(jnp.maximum(jnp.min(neg, axis=1), 0.0))
    return jnp.mean(jnp.maximum(hp - hn + margin, 0.0))


if __name__ == "__main__":
    key = jax.random.PRNGKey(0)
    k1, k2, k3, k4 = jax.random.split(key, 4)

    # Case 1: tiny shape, f32 MXU operands -> tight match vs exact reference.
    B, D = 8, 32
    emb_small = jax.random.normal(k1, (B, D), dtype=jnp.float32)
    lab_small = jax.random.randint(k2, (B,), 0, 3, dtype=jnp.int32)
    out1 = jax.block_until_ready(
        online_triplet_loss(emb_small, lab_small, matmul_dtype=jnp.float32))
    ref1 = _reference_loss(emb_small, lab_small)
    assert jnp.allclose(out1, ref1, atol=1e-4, rtol=1e-4), (out1, ref1)

    # Case 2: bf16 operands (default), resident-column path (grid (2, 1)).
    B2, D2 = 160, 48
    emb_big = jax.random.normal(k3, (B2, D2), dtype=jnp.float32)
    lab_big = jax.random.randint(k4, (B2,), 0, 10, dtype=jnp.int32)
    out2 = jax.block_until_ready(online_triplet_loss(emb_big, lab_big))
    ref2_matched = _matched_reference(emb_big, lab_big)
    ref2_exact = _reference_loss(emb_big, lab_big)
    assert jnp.allclose(out2, ref2_matched, atol=1e-3, rtol=1e-3), (out2, ref2_matched)
    assert jnp.allclose(out2, ref2_exact, atol=3e-2, rtol=3e-2), (out2, ref2_exact)

    # Case 3: force the column-tiled path (2x2 grid, running max/min accumulators).
    out3 = jax.block_until_ready(
        online_triplet_loss(emb_big, lab_big, block_rows=128, block_cols=128))
    assert jnp.allclose(out3, ref2_matched, atol=1e-3, rtol=1e-3), (out3, ref2_matched)

    print("KERNEL_OK")
</pallas_src>

<mosaic_0001>
module attributes {stable_mosaic.version = 11 : i64} {
  func.func @_triplet_tile_kernel(%arg0: i32, %arg1: i32, %arg2: memref<128x2xf32, #tpu.memory_space<vmem>>, %arg3: memref<2x128xf32, #tpu.memory_space<vmem>>, %arg4: memref<128x128xf32, #tpu.memory_space<vmem>>, %arg5: memref<128x128xf32, #tpu.memory_space<vmem>>, %arg6: memref<128x1xf32, #tpu.memory_space<vmem>>, %arg7: memref<128x1xf32, #tpu.memory_space<vmem>>, %arg8: memref<128x1xf32, #tpu.memory_space<vmem>>) attributes {dimension_semantics = [#tpu.dimension_semantics<parallel>, #tpu.dimension_semantics<arbitrary>], iteration_bounds = array<i64: 1, 1>, scalar_prefetch = 0 : i64, scratch_operands = 2 : i64, tpu.core_type = #tpu.core_type<tc>, window_params = [{transform_indices = @transform_0, window_bounds = array<i64: 128, 2>}, {transform_indices = @transform_1, window_bounds = array<i64: 2, 128>}, {transform_indices = @transform_2, window_bounds = array<i64: 128, 128>}, {transform_indices = @transform_3, window_bounds = array<i64: 128, 128>}, {transform_indices = @transform_4, window_bounds = array<i64: 128, 1>}]} {
    %c0_i32 = arith.constant 0 : i32
    %0 = arith.cmpi eq, %arg1, %c0_i32 : i32
    %1 = arith.extui %0 : i1 to i32
    %c0_i32_0 = arith.constant 0 : i32
    %2 = arith.cmpi ne, %1, %c0_i32_0 : i32
    scf.if %2 {
      %cst_29 = arith.constant 0.000000e+00 : f32
      %54 = vector.broadcast %cst_29 : f32 to vector<128x1xf32>
      %c0_30 = arith.constant 0 : index
      %c0_31 = arith.constant 0 : index
      %55 = vector.load %arg7[%c0_30, %c0_31] : memref<128x1xf32, #tpu.memory_space<vmem>>, vector<128x1xf32>
      tpu.vector_store %arg7[%c0_30, %c0_31], %54 {strides = array<i32>} : memref<128x1xf32, #tpu.memory_space<vmem>>, vector<128x1xf32>,
      %cst_32 = arith.constant 1.000000e+02 : f32
      %56 = vector.broadcast %cst_32 : f32 to vector<128x1xf32>
      %c0_33 = arith.constant 0 : index
      %c0_34 = arith.constant 0 : index
      %57 = vector.load %arg8[%c0_33, %c0_34] : memref<128x1xf32, #tpu.memory_space<vmem>>, vector<128x1xf32>
      tpu.vector_store %arg8[%c0_33, %c0_34], %56 {strides = array<i32>} : memref<128x1xf32, #tpu.memory_space<vmem>>, vector<128x1xf32>,
    } else {
    }
    %c0 = arith.constant 0 : index
    %c0_1 = arith.constant 0 : index
    %3 = vector.load %arg4[%c0, %c0_1] : memref<128x128xf32, #tpu.memory_space<vmem>>, vector<128x128xf32>
    %c0_2 = arith.constant 0 : index
    %c0_3 = arith.constant 0 : index
    %4 = vector.load %arg5[%c0_2, %c0_3] : memref<128x128xf32, #tpu.memory_space<vmem>>, vector<128x128xf32>
    %cst = arith.constant dense<0.000000e+00> : vector<128x128xf32>
    %5 = tpu.matmul %3, %4, %cst {dimension_numbers = #tpu.dot_dimension_numbers<[1], [1], [0], [0], [0, 0, 1, 0], [], []>} : vector<128x128xf32>, vector<128x128xf32>, vector<128x128xf32> -> vector<128x128xf32>
    %c0_4 = arith.constant 0 : index
    %c0_5 = arith.constant 0 : index
    %6 = vector.load %arg2[%c0_4, %c0_5] : memref<128x2xf32, #tpu.memory_space<vmem>>, vector<128x1xf32>
    %c0_6 = arith.constant 0 : index
    %c1 = arith.constant 1 : index
    %7 = vector.load %arg2[%c0_6, %c1] : memref<128x2xf32, #tpu.memory_space<vmem>>, vector<128x1xf32>
    %c0_7 = arith.constant 0 : index
    %c0_8 = arith.constant 0 : index
    %8 = vector.load %arg3[%c0_7, %c0_8] : memref<2x128xf32, #tpu.memory_space<vmem>>, vector<1x128xf32>
    %c1_9 = arith.constant 1 : index
    %c0_10 = arith.constant 0 : index
    %9 = vector.load %arg3[%c1_9, %c0_10] : memref<2x128xf32, #tpu.memory_space<vmem>>, vector<1x128xf32>
    %10 = vector.broadcast %6 : vector<128x1xf32> to vector<128x128xf32>
    %11 = vector.broadcast %8 : vector<1x128xf32> to vector<128x128xf32>
    %12 = arith.addf %10, %11 : vector<128x128xf32>
    %cst_11 = arith.constant 2.000000e+00 : f32
    %13 = vector.broadcast %cst_11 : f32 to vector<128x128xf32>
    %14 = arith.mulf %13, %5 : vector<128x128xf32>
    %15 = arith.subf %12, %14 : vector<128x128xf32>
    %16 = vector.broadcast %7 : vector<128x1xf32> to vector<128x128xf32>
    %17 = vector.broadcast %9 : vector<1x128xf32> to vector<128x128xf32>
    %18 = arith.cmpf oeq, %16, %17 : vector<128x128xf32>
    %c128_i32 = arith.constant 128 : i32
    %19 = arith.muli %arg0, %c128_i32 : i32
    %20 = tpu.iota {dimensions = array<i32: 0>} : vector<128x128xi32>
    %21 = vector.broadcast %19 : i32 to vector<128x128xi32>
    %22 = arith.addi %21, %20 : vector<128x128xi32>
    %c128_i32_12 = arith.constant 128 : i32
    %23 = arith.muli %arg1, %c128_i32_12 : i32
    %24 = tpu.iota {dimensions = array<i32: 1>} : vector<128x128xi32>
    %25 = vector.broadcast %23 : i32 to vector<128x128xi32>
    %26 = arith.addi %25, %24 : vector<128x128xi32>
    %27 = arith.cmpi ne, %22, %26 : vector<128x128xi32>
    %c8_i32 = arith.constant 8 : i32
    %28 = vector.broadcast %c8_i32 : i32 to vector<128x128xi32>
    %29 = arith.cmpi slt, %26, %28 : vector<128x128xi32>
    %30 = arith.andi %18, %27 : vector<128x128xi1>
    %31 = arith.andi %30, %29 : vector<128x128xi1>
    %cst_13 = arith.constant 0.000000e+00 : f32
    %32 = vector.broadcast %cst_13 : f32 to vector<128x128xf32>
    %33 = arith.select %31, %15, %32 : vector<128x128xi1>, vector<128x128xf32>
    %cst_14 = arith.constant dense<true> : vector<128x128xi1>
    %34 = arith.xori %18, %cst_14 : vector<128x128xi1>
    %35 = arith.andi %34, %29 : vector<128x128xi1>
    %cst_15 = arith.constant 0.000000e+00 : f32
    %36 = vector.broadcast %cst_15 : f32 to vector<128x128xf32>
    %37 = arith.cmpf ogt, %15, %36 : vector<128x128xf32>
    %38 = arith.andi %35, %37 : vector<128x128xi1>
    %cst_16 = arith.constant 1.000000e+02 : f32
    %39 = vector.broadcast %cst_16 : f32 to vector<128x128xf32>
    %40 = arith.select %38, %15, %39 : vector<128x128xi1>, vector<128x128xf32>
    %c0_17 = arith.constant 0 : index
    %c0_18 = arith.constant 0 : index
    %41 = vector.load %arg7[%c0_17, %c0_18] : memref<128x1xf32, #tpu.memory_space<vmem>>, vector<128x1xf32>
    %cst_19 = arith.constant dense<0xFF800000> : vector<128xf32>
    %42 = vector.multi_reduction <maximumf>, %33, %cst_19 [1] : vector<128x128xf32> to vector<128xf32>
    %43 = vector.shape_cast %42 : vector<128xf32> to vector<128x1xf32>
    %44 = arith.maximumf %41, %43 : vector<128x1xf32>
    %c0_20 = arith.constant 0 : index
    %c0_21 = arith.constant 0 : index
    %45 = vector.load %arg7[%c0_20, %c0_21] : memref<128x1xf32, #tpu.memory_space<vmem>>, vector<128x1xf32>
    tpu.vector_store %arg7[%c0_20, %c0_21], %44 {strides = array<i32>} : memref<128x1xf32, #tpu.memory_space<vmem>>, vector<128x1xf32>,
    %c0_22 = arith.constant 0 : index
    %c0_23 = arith.constant 0 : index
    %46 = vector.load %arg8[%c0_22, %c0_23] : memref<128x1xf32, #tpu.memory_space<vmem>>, vector<128x1xf32>
    %cst_24 = arith.constant dense<0x7F800000> : vector<128xf32>
    %47 = vector.multi_reduction <minimumf>, %40, %cst_24 [1] : vector<128x128xf32> to vector<128xf32>
    %48 = vector.shape_cast %47 : vector<128xf32> to vector<128x1xf32>
    %49 = arith.minimumf %46, %48 : vector<128x1xf32>
    %c0_25 = arith.constant 0 : index
    %c0_26 = arith.constant 0 : index
    %50 = vector.load %arg8[%c0_25, %c0_26] : memref<128x1xf32, #tpu.memory_space<vmem>>, vector<128x1xf32>
    tpu.vector_store %arg8[%c0_25, %c0_26], %49 {strides = array<i32>} : memref<128x1xf32, #tpu.memory_space<vmem>>, vector<128x1xf32>,
    %c0_i32_27 = arith.constant 0 : i32
    %51 = arith.cmpi eq, %arg1, %c0_i32_27 : i32
    %52 = arith.extui %51 : i1 to i32
    %c0_i32_28 = arith.constant 0 : i32
    %53 = arith.cmpi ne, %52, %c0_i32_28 : i32
    scf.if %53 {
      %c0_29 = arith.constant 0 : index
      %c0_30 = arith.constant 0 : index
      %54 = vector.load %arg7[%c0_29, %c0_30] : memref<128x1xf32, #tpu.memory_space<vmem>>, vector<128x1xf32>
      %cst_31 = arith.constant 0.000000e+00 : f32
      %55 = vector.broadcast %cst_31 : f32 to vector<128x1xf32>
      %56 = arith.maximumf %54, %55 : vector<128x1xf32>
      %57 = math.sqrt %56 : vector<128x1xf32>
      %c0_32 = arith.constant 0 : index
      %c0_33 = arith.constant 0 : index
      %58 = vector.load %arg8[%c0_32, %c0_33] : memref<128x1xf32, #tpu.memory_space<vmem>>, vector<128x1xf32>
      %cst_34 = arith.constant 0.000000e+00 : f32
      %59 = vector.broadcast %cst_34 : f32 to vector<128x1xf32>
      %60 = arith.maximumf %58, %59 : vector<128x1xf32>
      %61 = math.sqrt %60 : vector<128x1xf32>
      %62 = arith.subf %57, %61 : vector<128x1xf32>
      %cst_35 = arith.constant 1.000000e+00 : f32
      %63 = vector.broadcast %cst_35 : f32 to vector<128x1xf32>
      %64 = arith.addf %62, %63 : vector<128x1xf32>
      %cst_36 = arith.constant 0.000000e+00 : f32
      %65 = vector.broadcast %cst_36 : f32 to vector<128x1xf32>
      %66 = arith.maximumf %64, %65 : vector<128x1xf32>
      %c0_37 = arith.constant 0 : index
      %c0_38 = arith.constant 0 : index
      %67 = vector.load %arg6[%c0_37, %c0_38] : memref<128x1xf32, #tpu.memory_space<vmem>>, vector<128x1xf32>
      tpu.vector_store %arg6[%c0_37, %c0_38], %66 {strides = array<i32>} : memref<128x1xf32, #tpu.memory_space<vmem>>, vector<128x1xf32>,
    } else {
    }
    return
  }
  func.func @transform_0(%arg0: i32, %arg1: i32) -> (i32, i32) {
    %c0_i32 = arith.constant 0 : i32
    %c0_i32_0 = arith.constant 0 : i32
    return %arg0, %c0_i32 : i32, i32
  }
  func.func @transform_1(%arg0: i32, %arg1: i32) -> (i32, i32) {
    %c0_i32 = arith.constant 0 : i32
    %c0_i32_0 = arith.constant 0 : i32
    return %c0_i32, %arg1 : i32, i32
  }
  func.func @transform_2(%arg0: i32, %arg1: i32) -> (i32, i32) {
    %c0_i32 = arith.constant 0 : i32
    %c0_i32_0 = arith.constant 0 : i32
    return %arg0, %c0_i32 : i32, i32
  }
  func.func @transform_3(%arg0: i32, %arg1: i32) -> (i32, i32) {
    %c0_i32 = arith.constant 0 : i32
    %c0_i32_0 = arith.constant 0 : i32
    return %arg1, %c0_i32 : i32, i32
  }
  func.func @transform_4(%arg0: i32, %arg1: i32) -> (i32, i32) {
    %c0_i32 = arith.constant 0 : i32
    %c0_i32_0 = arith.constant 0 : i32
    return %arg0, %c0_i32 : i32, i32
  }
}

</mosaic_0001>

<bundles_post_ra>
// kernel: online_triplet_loss.1
= control target key start
LH: loop header
LB: loop body
LE: loop exit
PB: predicated region body
PF: predicated region fallthrough
CT: control target
= control target key end

     0   :  { %v1381_v3 = vmov 0   ;;  %v1382_v40 = vmov 1   ;;  %vm2768_vm0 = vcmask 7168   ;;  %vm2769_vm6 = vmmov 1   ;;  %s2763_s3 = inlined_call_operand.vmem [shape: f32[128,128], index: 3, kind: input, shape index: {}, may-alias: {2,3}]   ;;  %s2764_s2 = inlined_call_operand.vmem [shape: f32[128,128], index: 2, kind: input, shape index: {}, may-alias: {2,3}]   ;;  %s2765_s0 = inlined_call_operand.vmem [shape: f32[128,2], index: 0, kind: input, shape index: {}]   ;;  %s2766_s1 = inlined_call_operand.vmem [shape: f32[2,128], index: 1, kind: input, shape index: {}]   ;;  %s2767_s4 = inlined_call_operand.vmem [shape: f32[128,1], index: 4, kind: output, shape index: {}]  }
   0x1   :  { %v70_v0 = vld [vmem:[%s2763_s3] sm:$0xff]  ;;  %v71_v1 = vld [vmem:[%s2763_s3 + $0x8] sm:$0xff]  ;;  %v72_v2 = vld [vmem:[%s2763_s3 + $0x10] sm:$0xff]  ;;  %1313 = vset.pattern.permute.xlu0 %v1381_v3  ;;  %1314 = vset.pattern.permute.xlu1 %v1381_v3 }
   0x2   :  { %v1260_v4 = vpack.c.bf16 %v71_v1, %v70_v0  ;;  %v73_v5 = vld [vmem:[%s2763_s3 + $0x18] sm:$0xff]  ;;  %v54_v7 = vld [vmem:[%s2764_s2] sm:$0xff]  ;;  %v75_v10 = vld [vmem:[%s2763_s3 + $0x28] sm:$0xff]  ;;  %v1383_v0 = vmov 0.0  }
   0x3   :  { %v1264_v6 = vpack.c.bf16 %v73_v5, %v72_v2  ;;  %v62_v8 = vld [vmem:[%s2764_s2 + $0x40] sm:$0xff]  ;;  %1236 = vmatprep.mubr.f32.mxu0 %v54_v7  ;;  %v1441_v13 = vld [vmem:[%s2765_s0 + $0x10] sm:$0xff]  ;;  %v1446_v14 = vld [vmem:[%s2765_s0 + $0x8] sm:$0xff]  ;;  %31 = vst.msk [vmem:[#allocation2 + $0x48] sm:$0xff] %vm2768_vm0, %v1383_v0 }
   0x4   :  { %1261 = vmatprep.subr.bf16.mxu0 %v1260_v4  ;;  %1292 = vmatprep.subr.bf16.mxu1 %v1260_v4  ;;  %v74_v9 = vld [vmem:[%s2763_s3 + $0x20] sm:$0xff]  ;;  %v76_v15 = vld [vmem:[%s2763_s3 + $0x30] sm:$0xff]  ;;  %v77_v16 = vld [vmem:[%s2763_s3 + $0x38] sm:$0xff]  ;;  %22 = vst.msk [vmem:[#allocation2] sm:$0xff] %vm2768_vm0, %v1383_v0 }
   0x5   :  { %1263 = vmatpush3.bf16.xpose.msra.mxu0 %v1260_v4  ;;  %1300 = vmatpush3.bf16.xpose.msra.mxu1 %v1260_v4  ;;  %v1268_v11 = vpack.c.bf16 %v75_v10, %v74_v9  ;;  %v231_v12 = vld [vmem:[%s2765_s0] sm:$0xff]  ;;  %v234_v17 = vld [vmem:[%s2765_s0 + $0x18] sm:$0xff]  ;;  %v1272_v19 = vpack.c.bf16 %v77_v16, %v76_v15  ;;  %v236_v20 = vld [vmem:[%s2765_s0 + $0x28] sm:$0xff]  ;;  %23 = vst.msk [vmem:[#allocation2 + $0x8] sm:$0xff] %vm2768_vm0, %v1383_v0  ;;  %v466_v16 = vlaneseq }
   0x6   :  { %1265 = vmatprep.subr.bf16.mxu0 %v1264_v6  ;;  %1293 = vmatprep.subr.bf16.mxu1 %v1264_v6  ;;  %v1462_v18 = vld [vmem:[%s2765_s0 + $0x20] sm:$0xff]  ;;  %v237_v21 = vld [vmem:[%s2765_s0 + $0x30] sm:$0xff]  ;;  %v79_v23 = vld [vmem:[%s2763_s3 + $0x48] sm:$0xff]  ;;  %24 = vst.msk [vmem:[#allocation2 + $0x10] sm:$0xff] %vm2768_vm0, %v1383_v0 }
   0x7   :  { %1248 = vmatprep.mubr.f32.mxu1 %v62_v8  ;;  %251 = vperm.xlu0 %1313, %v231_v12   ;;  %v78_v22 = vld [vmem:[%s2763_s3 + $0x40] sm:$0xff]  ;;  %v238_v24 = vld [vmem:[%s2765_s0 + $0x38] sm:$0xff]  ;;  %v240_v27 = vld [vmem:[%s2765_s0 + $0x48] sm:$0xff]  ;;  %25 = vst.msk [vmem:[#allocation2 + $0x18] sm:$0xff] %vm2768_vm0, %v1383_v0 }
   0x8   :  { %261 = vperm.xlu1 %1314, %v1441_v13   ;;  %v239_v25 = vld [vmem:[%s2765_s0 + $0x40] sm:$0xff]  ;;  %v1276_v26 = vpack.c.bf16 %v79_v23, %v78_v22  ;;  %v1489_v28 = vld [vmem:[%s2765_s0 + $0x50] sm:$0xff]  ;;  %v81_v30 = vld [vmem:[%s2763_s3 + $0x58] sm:$0xff]  ;;  %26 = vst.msk [vmem:[#allocation2 + $0x20] sm:$0xff] %vm2768_vm0, %v1383_v0 }
   0x9   :  { %v80_v29 = vld [vmem:[%s2763_s3 + $0x50] sm:$0xff]  ;;  %v242_v31 = vld [vmem:[%s2765_s0 + $0x58] sm:$0xff]  ;;  %v1504_v32 = vld [vmem:[%s2765_s0 + $0x60] sm:$0xff]  ;;  %27 = vst.msk [vmem:[#allocation2 + $0x28] sm:$0xff] %vm2768_vm0, %v1383_v0 }
   0xa   :  { %v1280_v33 = vpack.c.bf16 %v81_v30, %v80_v29  ;;  %v244_v34 = vld [vmem:[%s2765_s0 + $0x68] sm:$0xff]  ;;  %v1513_v35 = vld [vmem:[%s2765_s0 + $0x70] sm:$0xff]  ;;  %v82_v36 = vld [vmem:[%s2763_s3 + $0x60] sm:$0xff]  ;;  %28 = vst.msk [vmem:[#allocation2 + $0x30] sm:$0xff] %vm2768_vm0, %v1383_v0 }
   0xb   :  { %256 = vperm.xlu0 %1313, %v1446_v14   ;;  %v83_v37 = vld [vmem:[%s2763_s3 + $0x68] sm:$0xff]  ;;  %v246_v38 = vld [vmem:[%s2765_s0 + $0x78] sm:$0xff]  ;;  %v84_v41 = vld [vmem:[%s2763_s3 + $0x70] sm:$0xff]  ;;  %29 = vst.msk [vmem:[#allocation2 + $0x38] sm:$0xff] %vm2768_vm0, %v1383_v0 }
   0xc   :  { %266 = vperm.xlu1 %1314, %v234_v17   ;;  %v1284_v39 = vpack.c.bf16 %v83_v37, %v82_v36  ;;  %v85_v42 = vld [vmem:[%s2763_s3 + $0x78] sm:$0xff]  ;;  %v55_v44 = vld [vmem:[%s2764_s2 + $0x8] sm:$0xff]  ;;  %v56_v46 = vld [vmem:[%s2764_s2 + $0x10] sm:$0xff]  ;;  %30 = vst.msk [vmem:[#allocation2 + $0x40] sm:$0xff] %vm2768_vm0, %v1383_v0  ;;  %v2834_v36 = vmov 0 }
   0xd   :  { %1267 = vmatpush3.bf16.xpose.msra.mxu0 %v1264_v6  ;;  %1301 = vmatpush3.bf16.xpose.msra.mxu1 %v1264_v6  ;;  %v1288_v43 = vpack.c.bf16 %v85_v42, %v84_v41  ;;  %v63_v45 = vld [vmem:[%s2764_s2 + $0x48] sm:$0xff]  ;;  %v64_v47 = vld [vmem:[%s2764_s2 + $0x50] sm:$0xff]  ;;  %v57_v48 = vld [vmem:[%s2764_s2 + $0x18] sm:$0xff]  ;;  %32 = vst.msk [vmem:[#allocation2 + $0x50] sm:$0xff] %vm2768_vm0, %v1383_v0 }
   0xe   :  { %1269 = vmatprep.subr.bf16.mxu0 %v1268_v11  ;;  %1294 = vmatprep.subr.bf16.mxu1 %v1268_v11  ;;  %v65_v49 = vld [vmem:[%s2764_s2 + $0x58] sm:$0xff]  ;;  %v58_v50 = vld [vmem:[%s2764_s2 + $0x20] sm:$0xff]  ;;  %v59_v52 = vld [vmem:[%s2764_s2 + $0x28] sm:$0xff]  ;;  %33 = vst.msk [vmem:[#allocation2 + $0x58] sm:$0xff] %vm2768_vm0, %v1383_v0 }
   0xf   :  { %271 = vperm.xlu0 %1313, %v1462_v18   ;;  %v66_v51 = vld [vmem:[%s2764_s2 + $0x60] sm:$0xff]  ;;  %v67_v53 = vld [vmem:[%s2764_s2 + $0x68] sm:$0xff]  ;;  %v60_v54 = vld [vmem:[%s2764_s2 + $0x30] sm:$0xff]  ;;  %34 = vst.msk [vmem:[#allocation2 + $0x60] sm:$0xff] %vm2768_vm0, %v1383_v0 }
  0x10   :  { %276 = vperm.xlu1 %1314, %v236_v20   ;;  %v68_v55 = vld [vmem:[%s2764_s2 + $0x70] sm:$0xff]  ;;  %v61_v56 = vld [vmem:[%s2764_s2 + $0x38] sm:$0xff]  ;;  %35 = vst.msk [vmem:[#allocation2 + $0x68] sm:$0xff] %vm2768_vm0, %v1383_v0  ;;  %36 = vst.msk [vmem:[#allocation2 + $0x70] sm:$0xff] %vm2768_vm0, %v1383_v0 }
  0x11   :  { %v69_v57 = vld [vmem:[%s2764_s2 + $0x78] sm:$0xff]  ;;  %37 = vst.msk [vmem:[#allocation2 + $0x78] sm:$0xff] %vm2768_vm0, %v1383_v0  ;;  %v1665_v29 = vld [vmem:[%s2766_s1] ss:$0 sm:$0xff] }
  0x13   :  { %281 = vperm.xlu0 %1313, %v237_v21  }
  0x14   :  { %286 = vperm.xlu1 %1314, %v238_v24  }
  0x15   :  { %1271 = vmatpush3.bf16.xpose.msra.mxu0 %v1268_v11  ;;  %1302 = vmatpush3.bf16.xpose.msra.mxu1 %v1268_v11 }
  0x16   :  { %1273 = vmatprep.subr.bf16.mxu0 %v1272_v19  ;;  %1295 = vmatprep.subr.bf16.mxu1 %v1272_v19 }
  0x17   :  { %291 = vperm.xlu0 %1313, %v239_v25  }
  0x18   :  { %296 = vperm.xlu1 %1314, %v240_v27  }
  0x1b   :  { %301 = vperm.xlu0 %1313, %v1489_v28  }
  0x1c   :  { %306 = vperm.xlu1 %1314, %v242_v31  }
  0x1d   :  { %1275 = vmatpush3.bf16.xpose.msra.mxu0 %v1272_v19  ;;  %1303 = vmatpush3.bf16.xpose.msra.mxu1 %v1272_v19  ;;  %v1636_v19 = vld [vmem:[%s2766_s1 + $0x1] ss:$0 sm:$0xff] }
  0x1e   :  { %1277 = vmatprep.subr.bf16.mxu0 %v1276_v26  ;;  %1296 = vmatprep.subr.bf16.mxu1 %v1276_v26 }
  0x1f   :  { %311 = vperm.xlu0 %1313, %v1504_v32  }
  0x20   :  { %316 = vperm.xlu1 %1314, %v244_v34  }
  0x23   :  { %321 = vperm.xlu0 %1313, %v1513_v35  }
  0x24   :  { %326 = vperm.xlu1 %1314, %v246_v38  }
  0x25   :  { %1279 = vmatpush3.bf16.xpose.msra.mxu0 %v1276_v26  ;;  %1304 = vmatpush3.bf16.xpose.msra.mxu1 %v1276_v26 }
  0x26   :  { %1281 = vmatprep.subr.bf16.mxu0 %v1280_v33  ;;  %1297 = vmatprep.subr.bf16.mxu1 %v1280_v33 }
  0x27   :  { %1315 = vset.pattern.permute.xlu0 %v1382_v40 }
  0x28   :  { %382 = vperm.xlu0 %1315, %v231_v12   ;;  %1316 = vset.pattern.permute.xlu1 %v1382_v40 }
  0x29   :  { %386 = vperm.xlu1 %1316, %v1446_v14  }
  0x2c   :  { %394 = vperm.xlu0 %1315, %v234_v17  }
  0x2d   :  { %1283 = vmatpush3.bf16.xpose.msra.mxu0 %v1280_v33  ;;  %1305 = vmatpush3.bf16.xpose.msra.mxu1 %v1280_v33 }
  0x2e   :  { %1285 = vmatprep.subr.bf16.mxu0 %v1284_v39  ;;  %1298 = vmatprep.subr.bf16.mxu1 %v1284_v39 }
  0x2f   :  { %390 = vperm.xlu1 %1316, %v1441_v13  }
  0x30   :  { %402 = vperm.xlu0 %1315, %v236_v20   ;;  %v1638_v20 = vshrl.u32 %v466_v16, 7 }
  0x32   :  { %v468_v22 = vadd.s32 8, %v1638_v20  ;;  %v469_v33 = vadd.s32 16, %v1638_v20 }
  0x33   :  { %398 = vperm.xlu1 %1316, %v1462_v18   ;;  %v1631_v18 = vand.u32 127, %v466_v16 }
  0x34   :  { %410 = vperm.xlu0 %1315, %v238_v24   ;;  %v476_v24 = vadd.s32 72, %v1638_v20 }
  0x35   :  { %1287 = vmatpush3.bf16.xpose.msra.mxu0 %v1284_v39  ;;  %1306 = vmatpush3.bf16.xpose.msra.mxu1 %v1284_v39  ;;  %vm505_vm1 = vcmp.ne.s32.totalorder %v1638_v20, %v1631_v18  ;;  %vm506_vm4 = vcmp.ne.s32.totalorder %v468_v22, %v1631_v18  ;;  %vm2773_vm8 = vcmp.lt.s32.totalorder %v1631_v18, 8  ;;  %v2885_v22 = vmov 0 }
  0x36   :  { %1289 = vmatprep.subr.bf16.mxu0 %v1288_v43  ;;  %1299 = vmatprep.subr.bf16.mxu1 %v1288_v43  ;;  %vm514_vm9 = vcmp.ne.s32.totalorder %v476_v24, %v1631_v18 }
  0x37   :  { %406 = vperm.xlu1 %1316, %v237_v21  }
  0x38   :  { %418 = vperm.xlu0 %1315, %v240_v27  }
  0x3b   :  { %414 = vperm.xlu1 %1316, %v239_v25   ;;  %v475_v25 = vadd.s32 64, %v1638_v20 }
  0x3c   :  { %426 = vperm.xlu0 %1315, %v242_v31  }
  0x3d   :  { %1291 = vmatpush3.bf16.xpose.msra.mxu0 %v1288_v43  ;;  %1307 = vmatpush3.bf16.xpose.msra.mxu1 %v1288_v43  ;;  %vm513_vm12 = vcmp.ne.s32.totalorder %v475_v25, %v1631_v18  ;;  %v1792_v25 = vadd.s32 32, %v1638_v20 }
  0x3f   :  { %422 = vperm.xlu1 %1316, %v1489_v28  }
  0x40   :  { %434 = vperm.xlu0 %1315, %v244_v34  }
  0x43   :  { %430 = vperm.xlu1 %1316, %v1504_v32  }
  0x44   :  { %1237 = vmatmul.mubr.f32.vlgmr.msra.gmra.mrb[0].mxu0 %v55_v44  ;;  %1249 = vmatmul.mubr.f32.vlgmr.msra.gmra.mrb[0].mxu1 %v63_v45 }
  0x45   :  { %1239 = vmatprep.mubr.f32.mxu0 %v56_v46  ;;  %1251 = vmatprep.mubr.f32.mxu1 %v64_v47  ;;  %v470_v46 = vadd.s32 24, %v1638_v20 }
  0x46   :  { %442 = vperm.xlu0 %1315, %v246_v38  }
  0x47   :  { %438 = vperm.xlu1 %1316, %v1513_v35  }
  0x48   :  { %1240 = vmatmul.mubr.f32.gmra.mrb[2].mxu0 %v57_v48  ;;  %1252 = vmatmul.mubr.f32.gmra.mrb[2].mxu1 %v65_v49 }
  0x49   :  { %1242 = vmatprep.mubr.f32.mxu0 %v58_v50  ;;  %1254 = vmatprep.mubr.f32.mxu1 %v66_v51 }
  0x4c   :  { %1243 = vmatmul.mubr.f32.gmra.mrb[4].mxu0 %v59_v52  ;;  %1255 = vmatmul.mubr.f32.gmra.mrb[4].mxu1 %v67_v53 }
  0x4d   :  { %1245 = vmatprep.mubr.f32.mxu0 %v60_v54  ;;  %1257 = vmatprep.mubr.f32.mxu1 %v68_v55  ;;  %v1732_v54 = vadd.s32 88, %v1638_v20  ;;  %v1735_v55 = vadd.s32 80, %v1638_v20 }
  0x50   :  { %1246 = vmatmul.mubr.f32.gmra.mrb[6].mxu0 %v61_v56  ;;  %1258 = vmatmul.mubr.f32.gmra.mrb[6].mxu1 %v69_v57 }
  0x86   :  { %v1579_v58 = vpop.permute.xlu0 %251 }
  0x87   :  { %v1581_v59 = vpop.permute.xlu1 %261  ;;  %v333_v45 = vadd.f32 %v1665_v29, %v1579_v58 }
  0x8a   :  { %v1583_v60 = vpop.permute.xlu0 %256 }
  0x8b   :  { %v1585_v61 = vpop.permute.xlu1 %266  ;;  %v334_v38 = vadd.f32 %v1665_v29, %v1583_v60 }
  0x8e   :  { %v1587_v62 = vpop.permute.xlu0 %271 }
  0x8f   :  { %v1589_v63 = vpop.permute.xlu1 %276 }
  0x92   :  { %v1607_v1 = vpop.permute.xlu0 %281 }
  0x93   :  { %v1609_v2 = vpop.permute.xlu1 %286 }
  0x94   :  { %v340_v37 = vadd.f32 %v1665_v29, %v1609_v2 }
  0x96   :  { %v292_v3 = vpop.permute.xlu0 %291 }
  0x97   :  { %v297_v4 = vpop.permute.xlu1 %296  ;;  %v341_v50 = vadd.f32 %v1665_v29, %v292_v3 }
  0x98   :  { %v342_v39 = vadd.f32 %v1665_v29, %v297_v4 }
  0x9a   :  { %v1611_v5 = vpop.permute.xlu0 %301 }
  0x9b   :  { %v1613_v6 = vpop.permute.xlu1 %306 }
  0x9e   :  { %v1615_v7 = vpop.permute.xlu0 %311 }
  0x9f   :  { %v1617_v8 = vpop.permute.xlu1 %316 }
  0xa2   :  { %v1619_v9 = vpop.permute.xlu0 %321 }
  0xa3   :  { %v1621_v10 = vpop.permute.xlu1 %326 }
  0xa7   :  { %v383_v11 = vpop.permute.xlu0 %382 }
  0xa8   :  { %v387_v12 = vpop.permute.xlu1 %386  ;;  %vm449_vm2 = vcmp.eq.f32.partialorder %v383_v11, %v1636_v19 }
  0xa9   :  { %vm1650_vm3 = vmand %vm449_vm2, %vm505_vm1  ;;  %vm450_vm5 = vcmp.eq.f32.partialorder %v387_v12, %v1636_v19 }
  0xaa   :  { %vm1657_vm7 = vmxor %vm449_vm2, %vm2769_vm6 }
  0xab   :  { %v1623_v13 = vpop.permute.xlu0 %394  ;;  %vm1669_vm11 = vmand %vm450_vm5, %vm506_vm4 }
  0xac   :  { %vm1676_vm14 = vmxor %vm450_vm5, %vm2769_vm6  ;;  %vm507_vm5 = vcmp.ne.s32.totalorder %v469_v33, %v1631_v18 }
  0xad   :  { %vm1685_vm15 = vmand %vm1650_vm3, %vm2773_vm8 }
  0xae   :  { %v1625_v14 = vpop.permute.xlu1 %390  ;;  %vm1693_vm1 = vmand %vm1657_vm7, %vm2773_vm8 }
  0xaf   :  { %v1627_v15 = vpop.permute.xlu0 %402  ;;  %vm1726_vm4 = vmand %vm1669_vm11, %vm2773_vm8 }
  0xb2   :  { %v1629_v17 = vpop.permute.xlu1 %398 }
  0xb3   :  { %v1640_v21 = vpop.permute.xlu0 %410 }
  0xb6   :  { %v1643_v23 = vpop.permute.xlu1 %406 }
  0xb7   :  { %v419_v28 = vpop.permute.xlu0 %418 }
  0xb8   :  { %vm458_vm10 = vcmp.eq.f32.partialorder %v419_v28, %v1636_v19  ;;  %v338_v28 = vadd.f32 %v1665_v29, %v1589_v63 }
  0xb9   :  { %vm1702_vm2 = vmand %vm458_vm10, %vm514_vm9  ;;  %vm451_vm9 = vcmp.eq.f32.partialorder %v1625_v14, %v1636_v19 }
  0xba   :  { %v415_v30 = vpop.permute.xlu1 %414  ;;  %vm547_vm7 = vmand %vm1702_vm2, %vm2773_vm8  ;;  %vm452_vm2 = vcmp.eq.f32.partialorder %v1623_v13, %v1636_v19 }
  0xbb   :  { %vm457_vm13 = vcmp.eq.f32.partialorder %v415_v30, %v1636_v19  ;;  %vm1750_vm11 = vmxor %vm458_vm10, %vm2769_vm6 }
  0xbc   :  { %vm1713_vm3 = vmand %vm457_vm13, %vm513_vm12  ;;  %vm508_vm12 = vcmp.ne.s32.totalorder %v470_v46, %v1631_v18 }
  0xbd   :  { %vm1768_vm10 = vmxor %vm457_vm13, %vm2769_vm6  ;;  %vm515_vm6 = vcmp.ne.s32.totalorder %v1735_v55, %v1631_v18  ;;  %v472_v55 = vadd.s32 40, %v1638_v20 }
  0xbe   :  { %vm1787_vm13 = vmand %vm451_vm9, %vm507_vm5 }
  0xbf   :  { %vm587_vm5 = vmand %vm1676_vm14, %vm2773_vm8 }
 0x117   :  { %v1238_v34 = vpop.f32.mrb[0].mxu0  ;;  %v1250_v35 = vpop.f32.mrb[0].mxu1 }
 0x118   :  { %v350_v41 = vmul.f32 2.0, %v1238_v34  ;;  %v358_v42 = vmul.f32 2.0, %v1250_v35  ;;  %v152_v43 = vpop.f32.mrb[1].mxu0  ;;  %v192_v44 = vpop.f32.mrb[1].mxu1 }
 0x119   :  { %v349_v48 = vmul.f32 2.0, %v152_v43  ;;  %v357_v49 = vmul.f32 2.0, %v192_v44 }
 0x11a   :  { %v1718_v51 = vsub.f32 %v334_v38, %v350_v41  ;;  %v1720_v52 = vsub.f32 %v342_v39, %v358_v42  ;;  %v337_v38 = vadd.f32 %v1665_v29, %v1587_v62  ;;  %v339_v39 = vadd.f32 %v1665_v29, %v1607_v1  ;;  %v427_v41 = vpop.permute.xlu0 %426  ;;  %v423_v42 = vpop.permute.xlu1 %422 }
 0x11b   :  { %v1737_v56 = vsub.f32 %v333_v45, %v349_v48  ;;  %v1241_v57 = vpop.f32.mrb[2].mxu0  ;;  %v1739_v58 = vpop.f32.mrb[2].mxu1  ;;  %v1754_v0 = vsub.f32 %v341_v50, %v357_v49  ;;  %v348_v62 = vadd.f32 %v1665_v29, %v1621_v10 }
 0x11c   :  { %v162_v3 = vpop.f32.mrb[3].mxu0  ;;  %v1756_v4 = vpop.f32.mrb[3].mxu1  ;;  %v555_v11 = vsel %vm1726_vm4, %v1718_v51, 0.0  ;;  %v563_v12 = vsel %vm547_vm7, %v1720_v52, 0.0  ;;  %vm1776_vm4 = vmand %vm1713_vm3, %vm2773_vm8  ;;  %vm603_vm0 = vcmp.gt.f32.partialorder %v1718_v51, 0.0  ;;  %v352_v2 = vmul.f32 2.0, %v1241_v57 }
 0x11d   :  { %668 = vmax.xlane.f32.xlu0 %v555_v11  ;;  %684 = vmax.xlane.f32.xlu1 %v563_v12  ;;  %vm602_vm7 = vcmp.gt.f32.partialorder %v1737_v56, 0.0  ;;  %vm1811_vm3 = vmand %vm452_vm2, %vm508_vm12  ;;  %v562_v32 = vsel %vm1776_vm4, %v1754_v0, 0.0  ;;  %v554_v63 = vsel %vm1685_vm15, %v1737_v56, 0.0  ;;  %vm611_vm12 = vcmp.gt.f32.partialorder %v1720_v52, 0.0 }
 0x11e   :  { %vm1827_vm14 = vmand %vm1693_vm1, %vm602_vm7  ;;  %vm610_vm1 = vcmp.gt.f32.partialorder %v1754_v0, 0.0  ;;  %vm460_vm4 = vcmp.eq.f32.partialorder %v427_v41, %v1636_v19  ;;  %v351_v44 = vmul.f32 2.0, %v162_v3  ;;  %v347_v11 = vadd.f32 %v1665_v29, %v1619_v9  ;;  %v431_v47 = vpop.permute.xlu1 %430 }
 0x11f   :  { %v1244_v26 = vpop.f32.mrb[4].mxu0  ;;  %v1798_v27 = vpop.f32.mrb[4].mxu1  ;;  %vm1837_vm15 = vmand %vm587_vm5, %vm603_vm0  ;;  %v634_v60 = vsel %vm1827_vm14, %v1737_v56, 100.0  ;;  %v335_v56 = vadd.f32 %v1665_v29, %v1581_v59  ;;  %v336_v9 = vadd.f32 %v1665_v29, %v1585_v61  ;;  %v360_v61 = vmul.f32 2.0, %v1739_v58 }
 0x120   :  { %v354_v31 = vmul.f32 2.0, %v1244_v26  ;;  %v172_v33 = vpop.f32.mrb[5].mxu0  ;;  %v1815_v34 = vpop.f32.mrb[5].mxu1  ;;  %vm1852_vm0 = vmand %vm1768_vm10, %vm2773_vm8  ;;  %vm2811_vm10 = vmmov 1   ;;  %v635_v3 = vsel %vm1837_vm15, %v1718_v51, 100.0  ;;  %v359_v14 = vmul.f32 2.0, %v1756_v4 }
 0x121   :  { %v353_v40 = vmul.f32 2.0, %v172_v33  ;;  %682 = vmax.xlane.f32.xlu0 %v562_v32  ;;  %666 = vmax.xlane.f32.xlu1 %v554_v63  ;;  %vm1864_vm7 = vmand %vm1750_vm11, %vm2773_vm8  ;;  %v1948_v58 = vsub.f32 %v336_v9, %v352_v2  ;;  %v1950_v4 = vsub.f32 %v335_v56, %v351_v44  ;;  %v1385_v44 = vmov 100.0  }
 0x122   :  { %v1846_v1 = vsub.f32 %v338_v28, %v354_v31  ;;  %vm1872_vm5 = vmxor %vm452_vm2, %vm2811_vm10  ;;  %vm459_vm2 = vcmp.eq.f32.partialorder %v423_v42, %v1636_v19  ;;  %v479_v42 = vadd.s32 96, %v1638_v20  ;;  %v361_v13 = vmul.f32 2.0, %v1815_v34 }
 0x123   :  { %v1858_v45 = vsub.f32 %v337_v38, %v353_v40  ;;  %v1247_v10 = vpop.f32.mrb[6].mxu0  ;;  %v1259_v46 = vpop.f32.mrb[6].mxu1  ;;  %vm1886_vm11 = vmand %vm1852_vm0, %vm610_vm1  ;;  %vm2820_vm1 = vcmp.ne.s32.totalorder %v1732_v54, %v1631_v18  ;;  %v346_v34 = vadd.f32 %v1665_v29, %v1617_v8  ;;  %v2889_v59 = vmov 0 }
 0x124   :  { %v356_v49 = vmul.f32 2.0, %v1247_v10  ;;  %v364_v50 = vmul.f32 2.0, %v1259_v46  ;;  %v182_v53 = vpop.f32.mrb[7].mxu0  ;;  %v222_v57 = vpop.f32.mrb[7].mxu1  ;;  %vm1897_vm14 = vmand %vm1864_vm7, %vm611_vm12  ;;  %v642_v63 = vsel %vm1886_vm11, %v1754_v0, 100.0  ;;  %v344_v0 = vadd.f32 %v1665_v29, %v1613_v6 }
 0x125   :  { %v355_v12 = vmul.f32 2.0, %v182_v53  ;;  %v363_v16 = vmul.f32 2.0, %v222_v57  ;;  %747 = vmin.xlane.f32.xlu0 %v634_v60  ;;  %749 = vmin.xlane.f32.xlu1 %v635_v3  ;;  %vm1909_vm15 = vmxor %vm451_vm9, %vm2811_vm10  ;;  %v643_v35 = vsel %vm1897_vm14, %v1720_v52, 100.0  ;;  %vm509_vm7 = vcmp.ne.s32.totalorder %v1792_v25, %v1631_v18  ;;  %v435_v10 = vpop.permute.xlu0 %434 }
 0x126   :  { %v1913_v26 = vsub.f32 %v340_v37, %v356_v49  ;;  %v1915_v28 = vsub.f32 %v348_v62, %v364_v50  ;;  %vm1922_vm0 = vmand %vm460_vm4, %vm2820_vm1  ;;  %vm2772_vm11 = vcmp.eq.f32.partialorder %v1629_v17, %v1636_v19  ;;  %vm510_vm14 = vcmp.ne.s32.totalorder %v472_v55, %v1631_v18 }
 0x127   :  { %v1928_v31 = vsub.f32 %v339_v39, %v355_v12  ;;  %v1930_v33 = vsub.f32 %v347_v11, %v363_v16  ;;  %vm1935_vm9 = vmxor %vm460_vm4, %vm2811_vm10  ;;  %v343_v39 = vadd.f32 %v1665_v29, %v1611_v5  ;;  %v1982_v5 = vsub.f32 %v344_v0, %v360_v61 }
 0x128   :  { %vm1944_vm12 = vmand %vm459_vm2, %vm515_vm6  ;;  %v480_v25 = vadd.s32 104, %v1638_v20  ;;  %v473_v53 = vadd.s32 48, %v1638_v20  ;;  %v2871_v60 = vmov 0  ;;  %v474_v16 = vadd.s32 56, %v1638_v20 }
 0x129   :  { %vm1962_vm6 = vmxor %vm459_vm2, %vm2811_vm10  ;;  %763 = vmin.xlane.f32.xlu0 %v642_v63  ;;  %765 = vmin.xlane.f32.xlu1 %v643_v35  ;;  %v1984_v52 = vsub.f32 %v343_v39, %v359_v14  ;;  %v482_v61 = vadd.s32 120, %v1638_v20  ;;  %v439_v63 = vpop.permute.xlu1 %438 }
 0x12a   :  { %vm540_vm4 = vmand %vm1787_vm13, %vm2773_vm8 }
 0x12b   :  { %vm541_vm2 = vmand %vm1811_vm3, %vm2773_vm8  ;;  %v556_v6 = vsel %vm540_vm4, %v1950_v4, 0.0  ;;  %vm604_vm4 = vcmp.gt.f32.partialorder %v1950_v4, 0.0 }
 0x12c   :  { %v557_v24 = vsel %vm541_vm2, %v1948_v58, 0.0  ;;  %vm1992_vm13 = vmand %vm1944_vm12, %vm2773_vm8  ;;  %vm605_vm2 = vcmp.gt.f32.partialorder %v1948_v58, 0.0 }
 0x12d   :  { %670 = vmax.xlane.f32.xlu0 %v556_v6  ;;  %672 = vmax.xlane.f32.xlu1 %v557_v24  ;;  %vm549_vm1 = vmand %vm1922_vm0, %vm2773_vm8  ;;  %v564_v37 = vsel %vm1992_vm13, %v1984_v52, 0.0 }
 0x12e   :  { %vm588_vm12 = vmand %vm1909_vm15, %vm2773_vm8  ;;  %vm2833_vm15 = vcmp.eq.f32.partialorder %v1627_v15, %v1636_v19  ;;  %v565_v62 = vsel %vm549_vm1, %v1982_v5, 0.0 }
 0x12f   :  { %vm2015_vm3 = vmand %vm2772_vm11, %vm509_vm7 }
 0x130   :  { %vm589_vm0 = vmand %vm1872_vm5, %vm2773_vm8 }
 0x131   :  { %vm2026_vm10 = vmand %vm2833_vm15, %vm510_vm14  ;;  %686 = vmax.xlane.f32.xlu0 %v564_v37  ;;  %688 = vmax.xlane.f32.xlu1 %v565_v62 }
 0x132   :  { %v2835_v36 = vsel %vm2026_vm10, 4294967295, %v2834_v36  ;;  %vm2035_vm7 = vmand %vm588_vm12, %vm604_vm4  ;;  %vm2842_vm4 = vcmask 7168  }
 0x133   :  { %vm2040_vm5 = vmand %vm589_vm0, %vm605_vm2  ;;  %39 = vst.msk [vmem:[#allocation3 + $0x8] sm:$0xff] %vm2842_vm4, %v1385_v44  ;;  %v636_v48 = vsel %vm2035_vm7, %v1950_v4, 100.0  ;;  %vm2865_vm7 = vcmp.gt.f32.partialorder %v1982_v5, 0.0  ;;  %v481_v4 = vadd.s32 112, %v1638_v20  ;;  %v2898_v20 = vmov 0 }
 0x134   :  { %vm2049_vm13 = vmand %vm1962_vm6, %vm2773_vm8  ;;  %v637_v49 = vsel %vm2040_vm5, %v1948_v58, 100.0  ;;  %vm2866_vm5 = vcmp.eq.f32.partialorder %v1629_v17, %v1636_v19  ;;  %v362_v17 = vmul.f32 2.0, %v1798_v27  ;;  %v345_v27 = vadd.f32 %v1665_v29, %v1615_v7  ;;  %v443_v58 = vpop.permute.xlu0 %442 }
 0x135   :  { %vm2843_vm12 = vmmov %vm2842_vm4  ;;  %751 = vmin.xlane.f32.xlu0 %v636_v48  ;;  %753 = vmin.xlane.f32.xlu1 %v637_v49 }
 0x136   :  { %38 = vst.msk [vmem:[#allocation3] sm:$0xff] %vm2843_vm12, %v1385_v44  ;;  %vm2844_vm2 = vmmov %vm2842_vm4  ;;  %v378_v56 = vsub.f32 %v346_v34, %v362_v17  ;;  %v377_v7 = vsub.f32 %v345_v27, %v361_v13  ;;  %v653_v34 = vld [vmem:[#allocation2 + $0x18] sm:$0xff] }
 0x137   :  { %40 = vst.msk [vmem:[#allocation3 + $0x10] sm:$0xff] %vm2844_vm2, %v1385_v44  ;;  %vm2845_vm0 = vmmov %vm2844_vm2 }
 0x138   :  { %41 = vst.msk [vmem:[#allocation3 + $0x18] sm:$0xff] %vm2845_vm0, %v1385_v44  ;;  %vm2846_vm15 = vmmov %vm2845_vm0 }
 0x139   :  { %42 = vst.msk [vmem:[#allocation3 + $0x20] sm:$0xff] %vm2846_vm15, %v1385_v44  ;;  %vm2847_vm11 = vmmov %vm2845_vm0 }
 0x13a   :  { %43 = vst.msk [vmem:[#allocation3 + $0x28] sm:$0xff] %vm2847_vm11, %v1385_v44  ;;  %vm2848_vm14 = vmmov %vm2845_vm0  ;;  %vm2857_vm11 = vcmp.lt.s32.totalorder %v1631_v18, 8 }
 0x13b   :  { %44 = vst.msk [vmem:[#allocation3 + $0x30] sm:$0xff] %vm2848_vm14, %v1385_v44  ;;  %vm2849_vm6 = vmmov %vm2845_vm0  ;;  %vm2858_vm14 = vmmov 1  }
 0x13c   :  { %45 = vst.msk [vmem:[#allocation3 + $0x38] sm:$0xff] %vm2849_vm6, %v1385_v44  ;;  %vm2850_vm8 = vmmov %vm2845_vm0  ;;  %vm518_vm6 = vcmp.ne.s32.totalorder %v480_v25, %v1631_v18  ;;  %v651_v25 = vld [vmem:[#allocation2 + $0x8] sm:$0xff] }
 0x13d   :  { %46 = vst.msk [vmem:[#allocation3 + $0x40] sm:$0xff] %vm2850_vm8, %v1385_v44  ;;  %vm2851_vm1 = vmmov %vm2845_vm0 }
 0x13e   :  { %47 = vst.msk [vmem:[#allocation3 + $0x48] sm:$0xff] %vm2851_vm1, %v1385_v44  ;;  %vm2852_vm10 = vmmov %vm2845_vm0 }
 0x13f   :  { %48 = vst.msk [vmem:[#allocation3 + $0x50] sm:$0xff] %vm2852_vm10, %v1385_v44  ;;  %vm2853_vm4 = vmmov %vm2845_vm0  ;;  %vm2859_vm10 = vcmp.eq.f32.partialorder %v1627_v15, %v1636_v19 }
 0x140   :  { %49 = vst.msk [vmem:[#allocation3 + $0x58] sm:$0xff] %vm2853_vm4, %v1385_v44  ;;  %vm2854_vm12 = vmmov %vm2845_vm0  ;;  %vm462_vm4 = vcmp.eq.f32.partialorder %v435_v10, %v1636_v19 }
 0x141   :  { %50 = vst.msk [vmem:[#allocation3 + $0x60] sm:$0xff] %vm2854_vm12, %v1385_v44  ;;  %vm2855_vm2 = vmmov %vm2845_vm0 }
 0x142   :  { %51 = vst.msk [vmem:[#allocation3 + $0x68] sm:$0xff] %vm2855_vm2, %v1385_v44  ;;  %vm2856_vm15 = vmmov %vm2845_vm0  ;;  %vm517_vm2 = vcmp.ne.s32.totalorder %v479_v42, %v1631_v18  ;;  %v650_v42 = vld [vmem:[#allocation2] sm:$0xff] }
 0x143   :  { %52 = vst.msk [vmem:[#allocation3 + $0x70] sm:$0xff] %vm2845_vm0, %v1385_v44  ;;  %vm597_vm8 = vmand %vm1935_vm9, %vm2857_vm11  ;;  %vm2862_vm9 = vcmp.gt.f32.partialorder %v1984_v52, 0.0  ;;  %vm461_vm0 = vcmp.eq.f32.partialorder %v431_v47, %v1636_v19 }
 0x144   :  { %53 = vst.msk [vmem:[#allocation3 + $0x78] sm:$0xff] %vm2856_vm15, %v1385_v44  ;;  %vm2078_vm1 = vmxor %vm2859_vm10, %vm2858_vm14  ;;  %v732_v44 = vld [vmem:[#allocation3 + $0x8] sm:$0xff]  ;;  %v739_v3 = vld [vmem:[#allocation3 + $0x40] sm:$0xff] }
 0x145   :  { %vm2094_vm12 = vmand %vm2049_vm13, %vm2862_vm9  ;;  %v740_v57 = vld [vmem:[#allocation3 + $0x48] sm:$0xff] }
 0x146   :  { %vm629_vm15 = vmand %vm597_vm8, %vm2865_vm7  ;;  %v644_v11 = vsel %vm2094_vm12, %v1984_v52, 100.0  ;;  %vm511_vm12 = vcmp.ne.s32.totalorder %v473_v53, %v1631_v18  ;;  %vm2879_vm7 = vnez %v2835_v36  ;;  %v659_v36 = vld [vmem:[#allocation2 + $0x48] sm:$0xff] }
 0x147   :  { %vm2106_vm11 = vmxor %vm2866_vm5, %vm2858_vm14  ;;  %v645_v12 = vsel %vm629_vm15, %v1982_v5, 100.0  ;;  %767 = vmin.xlane.f32.xlu0 %v644_v11 }
 0x148   :  { %vm2111_vm13 = vmand %vm462_vm4, %vm518_vm6  ;;  %769 = vmin.xlane.f32.xlu1 %v645_v12 }
 0x149   :  { %vm2116_vm10 = vmxor %vm462_vm4, %vm2858_vm14  ;;  %vm2877_vm4 = vcmp.lt.s32.totalorder %v1631_v18, 8 }
 0x14a   :  { %v2872_v60 = vsel %vm2116_vm10, 4294967295, %v2871_v60  ;;  %vm2120_vm8 = vmand %vm461_vm0, %vm517_vm2  ;;  %vm2884_vm2 = vcmp.eq.f32.partialorder %v1643_v23, %v1636_v19  ;;  %vm2888_vm10 = vcmp.eq.f32.partialorder %v1640_v21, %v1636_v19 }
 0x14b   :  { %vm2132_vm6 = vmxor %vm461_vm0, %vm2858_vm14 }
 0x14c   :  { %vm542_vm9 = vmand %vm2015_vm3, %vm2877_vm4 }
 0x14d   :  { %vm2878_vm0 = vmmov %vm2877_vm4  ;;  %v558_v9 = vsel %vm542_vm9, %v1858_v45, 0.0  ;;  %vm512_vm4 = vcmp.ne.s32.totalorder %v474_v16, %v1631_v18 }
 0x14e   :  { %vm543_vm15 = vmand %vm2879_vm7, %vm2878_vm0  ;;  %674 = vmax.xlane.f32.xlu0 %v558_v9  ;;  %vm606_vm7 = vcmp.gt.f32.partialorder %v1858_v45, 0.0 }
 0x14f   :  { %v559_v8 = vsel %vm543_vm15, %v1846_v1, 0.0  ;;  %vm2880_vm5 = vmmov %vm2878_vm0 }
 0x150   :  { %vm2157_vm3 = vmand %vm2120_vm8, %vm2880_vm5  ;;  %676 = vmax.xlane.f32.xlu1 %v559_v8  ;;  %vm607_vm5 = vcmp.gt.f32.partialorder %v1846_v1, 0.0 }
 0x151   :  { %vm551_vm9 = vmand %vm2111_vm13, %vm2878_vm0  ;;  %v566_v14 = vsel %vm2157_vm3, %v377_v7, 0.0 }
 0x152   :  { %vm2883_vm15 = vmmov %vm2878_vm0  ;;  %v567_v32 = vsel %vm551_vm9, %v378_v56, 0.0  ;;  %690 = vmax.xlane.f32.xlu0 %v566_v14  ;;  %vm2895_vm9 = vnez %v2872_v60 }
 0x153   :  { %vm590_vm8 = vmand %vm2106_vm11, %vm2883_vm15  ;;  %vm615_vm15 = vcmp.gt.f32.partialorder %v378_v56, 0.0 }
 0x154   :  { %vm2179_vm14 = vmand %vm2884_vm2, %vm511_vm12  ;;  %692 = vmax.xlane.f32.xlu1 %v567_v32  ;;  %v661_v32 = vld [vmem:[#allocation2 + $0x58] sm:$0xff] }
 0x155   :  { %v2886_v22 = vsel %vm2179_vm14, 4294967295, %v2885_v22  ;;  %vm2887_vm13 = vmmov %vm2878_vm0 }
 0x156   :  { %vm591_vm0 = vmand %vm2078_vm1, %vm2887_vm13 }
 0x157   :  { %vm2190_vm11 = vmand %vm2888_vm10, %vm512_vm4  ;;  %vm614_vm10 = vcmp.gt.f32.partialorder %v377_v7, 0.0 }
 0x158   :  { %v2890_v59 = vsel %vm2190_vm11, 4294967295, %v2889_v59  ;;  %vm2197_vm12 = vmand %vm590_vm8, %vm606_vm7  ;;  %vm2896_vm8 = vmmov 1  }
 0x159   :  { %vm623_vm1 = vmand %vm591_vm0, %vm607_vm5  ;;  %vm520_vm5 = vcmp.ne.s32.totalorder %v482_v61, %v1631_v18  ;;  %vm464_vm0 = vcmp.eq.f32.partialorder %v443_v58, %v1636_v19  ;;  %v638_v35 = vsel %vm2197_vm12, %v1858_v45, 100.0  ;;  %v660_v58 = vld [vmem:[#allocation2 + $0x50] sm:$0xff] }
 0x15a   :  { %vm2893_vm2 = vmmov %vm2887_vm13  ;;  %vm2897_vm13 = vcmp.eq.f32.partialorder %v1640_v21, %v1636_v19  ;;  %v639_v55 = vsel %vm623_vm1, %v1846_v1, 100.0  ;;  %755 = vmin.xlane.f32.xlu0 %v638_v35  ;;  %v2905_v1 = vmov 0  ;;  %v733_v21 = vld [vmem:[#allocation3 + $0x10] sm:$0xff] }
 0x15b   :  { %vm598_vm4 = vmand %vm2132_vm6, %vm2893_vm2  ;;  %757 = vmin.xlane.f32.xlu1 %v639_v55 }
 0x15c   :  { %vm2894_vm3 = vmmov %vm2893_vm2  ;;  %vm519_vm2 = vcmp.ne.s32.totalorder %v481_v4, %v1631_v18 }
 0x15d   :  { %vm599_vm7 = vmand %vm2895_vm9, %vm2894_vm3  ;;  %vm463_vm3 = vcmp.eq.f32.partialorder %v439_v63, %v1636_v19  ;;  %v734_v63 = vld [vmem:[#allocation3 + $0x18] sm:$0xff] }
 0x15e   :  { %vm2214_vm11 = vmxor %vm2897_vm13, %vm2896_vm8  ;;  %vm2900_vm13 = vcmp.eq.f32.partialorder %v1643_v23, %v1636_v19 }
 0x15f   :  { %v2899_v20 = vsel %vm2214_vm11, 4294967295, %v2898_v20  ;;  %vm630_vm6 = vmand %vm598_vm4, %vm614_vm10  ;;  %vm2909_vm4 = vcmp.lt.s32.totalorder %v1631_v18, 8 }
 0x160   :  { %vm631_vm9 = vmand %vm599_vm7, %vm615_vm15  ;;  %v646_v38 = vsel %vm630_vm6, %v377_v7, 100.0  ;;  %vm2910_vm15 = vnez %v2886_v22  ;;  %v652_v7 = vld [vmem:[#allocation2 + $0x10] sm:$0xff] }
 0x161   :  { %vm2230_vm11 = vmxor %vm2900_vm13, %vm2896_vm8  ;;  %v647_v39 = vsel %vm631_vm9, %v378_v56, 100.0  ;;  %771 = vmin.xlane.f32.xlu0 %v646_v38  ;;  %vm608_vm9 = vcmp.gt.f32.partialorder %v1928_v31, 0.0 }
 0x162   :  { %vm2234_vm14 = vmand %vm464_vm0, %vm520_vm5  ;;  %773 = vmin.xlane.f32.xlu1 %v647_v39 }
 0x163   :  { %vm2239_vm12 = vmxor %vm464_vm0, %vm2896_vm8  ;;  %vm2912_vm0 = vnez %v2890_v59 }
 0x164   :  { %v2906_v1 = vsel %vm2239_vm12, 4294967295, %v2905_v1  ;;  %vm536_vm1 = vmand %vm463_vm3, %vm519_vm2 }
 0x165   :  { %vm2244_vm10 = vmxor %vm463_vm3, %vm2896_vm8 }
 0x166   :  { %vm544_vm7 = vmand %vm2910_vm15, %vm2909_vm4 }
 0x167   :  { %vm2911_vm5 = vmmov %vm2909_vm4  ;;  %v560_v19 = vsel %vm544_vm7, %v1928_v31, 0.0  ;;  %vm609_vm7 = vcmp.gt.f32.partialorder %v1913_v26, 0.0 }
 0x168   :  { %vm545_vm13 = vmand %vm2912_vm0, %vm2911_vm5  ;;  %678 = vmax.xlane.f32.xlu0 %v560_v19 }
 0x169   :  { %v561_v23 = vsel %vm545_vm13, %v1913_v26, 0.0  ;;  %vm2913_vm8 = vmmov %vm2909_vm4 }
 0x16a   :  { %vm552_vm6 = vmand %vm536_vm1, %vm2913_vm8  ;;  %680 = vmax.xlane.f32.xlu1 %v561_v23  ;;  %vm2917_vm1 = vnez %v2899_v20  ;;  %vm616_vm8 = vcmp.gt.f32.partialorder %v1930_v33, 0.0 }
 0x16b   :  { %vm2914_vm2 = vmmov %vm2909_vm4  ;;  %v568_v5 = vsel %vm552_vm6, %v1930_v33, 0.0 }
 0x16c   :  { %vm553_vm3 = vmand %vm2234_vm14, %vm2914_vm2  ;;  %694 = vmax.xlane.f32.xlu0 %v568_v5 }
 0x16d   :  { %vm2915_vm4 = vmmov %vm2914_vm2  ;;  %v569_v52 = vsel %vm553_vm3, %v1915_v28, 0.0 }
 0x16e   :  { %vm592_vm15 = vmand %vm2230_vm11, %vm2915_vm4  ;;  %696 = vmax.xlane.f32.xlu1 %v569_v52  ;;  %vm617_vm4 = vcmp.gt.f32.partialorder %v1915_v28, 0.0 }
 0x16f   :  { %vm2916_vm5 = vmmov %vm2914_vm2 }
 0x170   :  { %vm593_vm0 = vmand %vm2917_vm1, %vm2916_vm5  ;;  %vm2919_vm5 = vnez %v2906_v1 }
 0x171   :  { %vm624_vm13 = vmand %vm592_vm15, %vm608_vm9 }
 0x172   :  { %vm625_vm14 = vmand %vm593_vm0, %vm609_vm7  ;;  %v640_v6 = vsel %vm624_vm13, %v1928_v31, 100.0  ;;  %v658_v31 = vld [vmem:[#allocation2 + $0x40] sm:$0xff] }
 0x173   :  { %vm600_vm11 = vmand %vm2244_vm10, %vm2914_vm2  ;;  %v641_v24 = vsel %vm625_vm14, %v1913_v26, 100.0  ;;  %759 = vmin.xlane.f32.xlu0 %v640_v6 }
 0x174   :  { %vm2918_vm12 = vmmov %vm2914_vm2  ;;  %761 = vmin.xlane.f32.xlu1 %v641_v24 }
 0x175   :  { %vm601_vm6 = vmand %vm2919_vm5, %vm2918_vm12  ;;  %vm2920_vm12 = vcmask 7168  }
 0x176   :  { %vm632_vm3 = vmand %vm600_vm11, %vm616_vm8 }
 0x177   :  { %vm633_vm9 = vmand %vm601_vm6, %vm617_vm4  ;;  %v648_v40 = vsel %vm632_vm3, %v1930_v33, 100.0 }
 0x178   :  { %v649_v30 = vsel %vm633_vm9, %v1915_v28, 100.0  ;;  %775 = vmin.xlane.f32.xlu0 %v648_v40  ;;  %vm2921_vm10 = vmmov %vm2920_vm12  ;;  %v731_v28 = vld [vmem:[#allocation3] sm:$0xff] }
 0x179   :  { %777 = vmin.xlane.f32.xlu1 %v649_v30  ;;  %vm2922_vm15 = vmmov %vm2921_vm10 }
 0x17a   :  { %vm2923_vm7 = vmmov %vm2921_vm10 }
 0x17b   :  { %vm2924_vm1 = vmmov %vm2923_vm7 }
 0x17c   :  { %vm2925_vm0 = vmmov %vm2924_vm1 }
 0x17d   :  { %vm2926_vm13 = vmmov %vm2925_vm0 }
 0x17e   :  { %vm2927_vm14 = vmmov %vm2925_vm0 }
 0x17f   :  { %vm2928_vm8 = vmmov %vm2925_vm0 }
 0x180   :  { %vm2929_vm2 = vmmov %vm2925_vm0 }
 0x181   :  { %vm2930_vm5 = vmmov %vm2925_vm0 }
 0x182   :  { %vm2931_vm6 = vmmov %vm2925_vm0 }
 0x1aa   :  { %v685_v18 = vpop.xlane.xlu1 %684  ;;  %v669_v37 = vpop.xlane.xlu0 %668 }
 0x1ab   :  { %v707_v62 = vmax.f32 %v659_v36, %v685_v18  ;;  %v699_v41 = vmax.f32 %v651_v25, %v669_v37  ;;  %v742_v25 = vld [vmem:[#allocation3 + $0x58] sm:$0xff]  ;;  %v741_v18 = vld [vmem:[#allocation3 + $0x50] sm:$0xff] }
 0x1ad   :  { %724 = vst.msk [vmem:[#allocation2 + $0x48] sm:$0xff] %vm2920_vm12, %v707_v62 }
 0x1ae   :  { %716 = vst.msk [vmem:[#allocation2 + $0x8] sm:$0xff] %vm2921_vm10, %v699_v41  ;;  %v667_v26 = vpop.xlane.xlu1 %666  ;;  %v683_v43 = vpop.xlane.xlu0 %682 }
 0x1af   :  { %v698_v2 = vmax.f32 %v650_v42, %v667_v26  ;;  %v706_v33 = vmax.f32 %v658_v31, %v683_v43 }
 0x1b1   :  { %715 = vst.msk [vmem:[#allocation2] sm:$0xff] %vm2922_vm15, %v698_v2  ;;  %vm2932_vm15 = vmmov %vm2925_vm0 }
 0x1b2   :  { %723 = vst.msk [vmem:[#allocation2 + $0x40] sm:$0xff] %vm2923_vm7, %v706_v33  ;;  %v750_v10 = vpop.xlane.xlu1 %749  ;;  %v748_v46 = vpop.xlane.xlu0 %747 }
 0x1b3   :  { %v780_v47 = vmin.f32 %v732_v44, %v750_v10  ;;  %v779_v48 = vmin.f32 %v731_v28, %v748_v46 }
 0x1b4   :  { %v823_v49 = vld [vmem:[#allocation2 + $0x48] sm:$0xff] }
 0x1b5   :  { %v815_v15 = vld [vmem:[#allocation2 + $0x8] sm:$0xff]  ;;  %v2294_v50 = vmax.f32 %v823_v49, 0.0  ;;  %796 = vst.msk [vmem:[#allocation3 + $0x8] sm:$0xff] %vm2924_vm1, %v780_v47 }
 0x1b6   :  { %v2296_v53 = vmax.f32 %v815_v15, 0.0  ;;  %795 = vst.msk [vmem:[#allocation3] sm:$0xff] %vm2925_vm0, %v779_v48  ;;  %v766_v60 = vpop.xlane.xlu1 %765  ;;  %v764_v17 = vpop.xlane.xlu0 %763 }
 0x1b7   :  { %1317 = vrsqrt.f32 %v2294_v50  ;;  %v788_v16 = vmin.f32 %v740_v57, %v766_v60  ;;  %v787_v51 = vmin.f32 %v739_v3, %v764_v17  ;;  %vm911_vm11 = vcmp.eq.f32.partialorder %v2294_v50, inf }
 0x1b8   :  { %1319 = vrsqrt.f32 %v2296_v53  ;;  %v814_v13 = vld [vmem:[#allocation2] sm:$0xff]  ;;  %vm913_vm4 = vcmp.eq.f32.partialorder %v2294_v50, 0.0  ;;  %v914_v1 = vand.u32 2147483648, %v2294_v50  ;;  %vm855_vm3 = vcmp.eq.f32.partialorder %v2296_v53, inf }
 0x1b9   :  { %v822_v11 = vld [vmem:[#allocation2 + $0x40] sm:$0xff]  ;;  %v2302_v12 = vmax.f32 %v814_v13, 0.0  ;;  %804 = vst.msk [vmem:[#allocation3 + $0x48] sm:$0xff] %vm2926_vm13, %v788_v16  ;;  %vm857_vm9 = vcmp.eq.f32.partialorder %v2296_v53, 0.0  ;;  %v858_v24 = vand.u32 2147483648, %v2296_v53 }
 0x1ba   :  { %v2304_v27 = vmax.f32 %v822_v11, 0.0  ;;  %v673_v56 = vpop.xlane.xlu1 %672  ;;  %v671_v9 = vpop.xlane.xlu0 %670  ;;  %803 = vst.msk [vmem:[#allocation3 + $0x40] sm:$0xff] %vm2927_vm14, %v787_v51 }
 0x1bb   :  { %1321 = vrsqrt.f32 %v2302_v12  ;;  %v701_v61 = vmax.f32 %v653_v34, %v673_v56  ;;  %v700_v14 = vmax.f32 %v652_v7, %v671_v9  ;;  %vm848_vm12 = vcmp.eq.f32.partialorder %v2302_v12, inf }
 0x1bc   :  { %v959_v8 = vld [vmem:[#allocation3 + $0x8] sm:$0xff]  ;;  %1323 = vrsqrt.f32 %v2304_v27  ;;  %vm850_vm10 = vcmp.eq.f32.partialorder %v2302_v12, 0.0  ;;  %v851_v37 = vand.u32 2147483648, %v2302_v12  ;;  %vm904_vm7 = vcmp.eq.f32.partialorder %v2304_v27, inf }
 0x1bd   :  { %v958_v29 = vld [vmem:[#allocation3] sm:$0xff]  ;;  %v2309_v22 = vmax.f32 %v959_v8, 0.0  ;;  %718 = vst.msk [vmem:[#allocation2 + $0x18] sm:$0xff] %vm2928_vm8, %v701_v61  ;;  %v907_v62 = vand.u32 2147483648, %v2304_v27 }
 0x1be   :  { %v2311_v59 = vmax.f32 %v958_v29, 0.0  ;;  %v689_v54 = vpop.xlane.xlu1 %688  ;;  %v687_v4 = vpop.xlane.xlu0 %686  ;;  %717 = vst.msk [vmem:[#allocation2 + $0x10] sm:$0xff] %vm2929_vm2, %v700_v14  ;;  %vm906_vm2 = vcmp.eq.f32.partialorder %v2304_v27, 0.0 }
 0x1bf   :  { %1325 = vrsqrt.f32 %v2309_v22  ;;  %v709_v35 = vmax.f32 %v661_v32, %v689_v54  ;;  %v708_v55 = vmax.f32 %v660_v58, %v687_v4  ;;  %vm999_vm1 = vcmp.eq.f32.partialorder %v2309_v22, inf }
 0x1c0   :  { %1327 = vrsqrt.f32 %v2311_v59  ;;  %v967_v38 = vld [vmem:[#allocation3 + $0x48] sm:$0xff]  ;;  %vm1001_vm13 = vcmp.eq.f32.partialorder %v2309_v22, 0.0  ;;  %v1002_v44 = vand.u32 2147483648, %v2309_v22  ;;  %vm992_vm14 = vcmp.eq.f32.partialorder %v2311_v59, inf }
 0x1c1   :  { %v1318_v20 = vpop.eup %1317  ;;  %v966_v39 = vld [vmem:[#allocation3 + $0x40] sm:$0xff]  ;;  %v2322_v5 = vmax.f32 %v967_v38, 0.0  ;;  %726 = vst.msk [vmem:[#allocation2 + $0x58] sm:$0xff] %vm2930_vm5, %v709_v35  ;;  %vm994_vm8 = vcmp.eq.f32.partialorder %v2311_v59, 0.0  ;;  %v995_v3 = vand.u32 2147483648, %v2311_v59 }
 0x1c2   :  { %v1320_v45 = vpop.eup %1319  ;;  %v754_v0 = vpop.xlane.xlu1 %753  ;;  %v910_v23 = vmul.f32 %v1318_v20, %v2294_v50  ;;  %v2324_v52 = vmax.f32 %v966_v39, 0.0  ;;  %725 = vst.msk [vmem:[#allocation2 + $0x50] sm:$0xff] %vm2931_vm6, %v708_v55 }
 0x1c3   :  { %v752_v19 = vpop.xlane.xlu0 %751  ;;  %v782_v6 = vmin.f32 %v734_v63, %v754_v0  ;;  %v854_v36 = vmul.f32 %v1320_v45, %v2296_v53  ;;  %1329 = vrsqrt.f32 %v2322_v5  ;;  %vm1055_vm5 = vcmp.eq.f32.partialorder %v2322_v5, inf }
 0x1c4   :  { %v781_v40 = vmin.f32 %v733_v21, %v752_v19  ;;  %v817_v41 = vld [vmem:[#allocation2 + $0x18] sm:$0xff]  ;;  %v912_v43 = vsel %vm911_vm11, %v2294_v50, %v910_v23  ;;  %1331 = vrsqrt.f32 %v2324_v52  ;;  %vm2933_vm11 = vmmov %vm2925_vm0  ;;  %vm1057_vm6 = vcmp.eq.f32.partialorder %v2322_v5, 0.0 }
 0x1c5   :  { %v1322_v30 = vpop.eup %1321  ;;  %798 = vst.msk [vmem:[#allocation3 + $0x18] sm:$0xff] %vm2932_vm15, %v782_v6  ;;  %v816_v42 = vld [vmem:[#allocation2 + $0x10] sm:$0xff]  ;;  %v2349_v28 = vmax.f32 %v817_v41, 0.0  ;;  %v856_v47 = vsel %vm855_vm3, %v2296_v53, %v854_v36  ;;  %v2359_v57 = vsel %vm913_vm4, %v914_v1, %v912_v43  ;;  %vm2934_vm4 = vmmov %vm2925_vm0  ;;  %v1058_v21 = vand.u32 2147483648, %v2322_v5 }
 0x1c6   :  { %797 = vst.msk [vmem:[#allocation3 + $0x10] sm:$0xff] %vm2925_vm0, %v781_v40  ;;  %v847_v2 = vmul.f32 %v1322_v30, %v2302_v12  ;;  %v1324_v33 = vpop.eup %1323  ;;  %v2351_v10 = vmax.f32 %v816_v42, 0.0  ;;  %v859_v56 = vsel %vm857_vm9, %v858_v24, %v856_v47  ;;  %vm1048_vm3 = vcmp.eq.f32.partialorder %v2324_v52, inf }
 0x1c7   :  { %1333 = vrsqrt.f32 %v2349_v28  ;;  %v903_v51 = vmul.f32 %v1324_v33, %v2304_v27  ;;  %vm1050_vm9 = vcmp.eq.f32.partialorder %v2324_v52, 0.0  ;;  %v1051_v39 = vand.u32 2147483648, %v2324_v52 }
 0x1c8   :  { %v825_v17 = vld [vmem:[#allocation2 + $0x58] sm:$0xff]  ;;  %v849_v50 = vsel %vm848_vm12, %v2302_v12, %v847_v2  ;;  %1335 = vrsqrt.f32 %v2351_v10  ;;  %vm869_vm12 = vcmp.eq.f32.partialorder %v2349_v28, inf  ;;  %vm871_vm15 = vcmp.eq.f32.partialorder %v2349_v28, 0.0 }
 0x1c9   :  { %v1326_v46 = vpop.eup %1325  ;;  %v824_v13 = vld [vmem:[#allocation2 + $0x50] sm:$0xff]  ;;  %v2389_v61 = vmax.f32 %v825_v17, 0.0  ;;  %v852_v32 = vsel %vm850_vm10, %v851_v37, %v849_v50  ;;  %v905_v35 = vsel %vm904_vm7, %v2304_v27, %v903_v51  ;;  %vm2935_vm10 = vmmov %vm2925_vm0  ;;  %v865_v47 = vand.u32 2147483648, %v2351_v10  ;;  %v663_v50 = vld [vmem:[#allocation2 + $0x68] sm:$0xff] }
 0x1ca   :  { %v1328_v15 = vpop.eup %1327  ;;  %v998_v60 = vmul.f32 %v1326_v46, %v2309_v22  ;;  %v2391_v53 = vmax.f32 %v824_v13, 0.0  ;;  %v908_v40 = vsel %vm906_vm2, %v907_v62, %v905_v35  ;;  %v655_v62 = vld [vmem:[#allocation2 + $0x28] sm:$0xff]  ;;  %vm2936_vm7 = vmmov %vm2925_vm0  ;;  %vm864_vm0 = vcmp.eq.f32.partialorder %v2351_v10, 0.0  ;;  %v662_v51 = vld [vmem:[#allocation2 + $0x60] sm:$0xff] }
 0x1cb   :  { %v991_v34 = vmul.f32 %v1328_v15, %v2311_v59  ;;  %1337 = vrsqrt.f32 %v2389_v61  ;;  %vm2938_vm2 = vmmov %vm2934_vm4  ;;  %v743_v35 = vld [vmem:[#allocation3 + $0x60] sm:$0xff] }
 0x1cc   :  { %v1000_v7 = vsel %vm999_vm1, %v2309_v22, %v998_v60  ;;  %v961_v9 = vld [vmem:[#allocation3 + $0x18] sm:$0xff]  ;;  %1339 = vrsqrt.f32 %v2391_v53  ;;  %vm862_vm1 = vcmp.eq.f32.partialorder %v2351_v10, inf  ;;  %v921_v13 = vand.u32 2147483648, %v2391_v53 }
 0x1cd   :  { %v1003_v8 = vsel %vm1001_vm13, %v1002_v44, %v1000_v7  ;;  %v993_v29 = vsel %vm992_vm14, %v2311_v59, %v991_v34  ;;  %v960_v14 = vld [vmem:[#allocation3 + $0x10] sm:$0xff]  ;;  %v2397_v4 = vmax.f32 %v961_v9, 0.0  ;;  %v1330_v20 = vpop.eup %1329  ;;  %vm925_vm13 = vcmp.eq.f32.partialorder %v2389_v61, inf  ;;  %v736_v9 = vld [vmem:[#allocation3 + $0x28] sm:$0xff] }
 0x1ce   :  { %v1103_v54 = vsub.f32 %v859_v56, %v1003_v8  ;;  %v996_v58 = vsel %vm994_vm8, %v995_v3, %v993_v29  ;;  %v1054_v59 = vmul.f32 %v1330_v20, %v2322_v5  ;;  %v2410_v45 = vmax.f32 %v960_v14, 0.0  ;;  %v1332_v1 = vpop.eup %1331  ;;  %vm2937_vm8 = vmmov %vm2934_vm4  ;;  %v744_v20 = vld [vmem:[#allocation3 + $0x68] sm:$0xff] }
 0x1cf   :  { %v1102_v55 = vsub.f32 %v852_v32, %v996_v58  ;;  %v1047_v23 = vmul.f32 %v1332_v1, %v2324_v52  ;;  %1341 = vrsqrt.f32 %v2397_v4  ;;  %v928_v3 = vand.u32 2147483648, %v2389_v61  ;;  %v735_v58 = vld [vmem:[#allocation3 + $0x20] sm:$0xff]  ;;  %v657_v1 = vld [vmem:[#allocation2 + $0x38] sm:$0xff] }
 0x1d0   :  { %v1119_v12 = vadd.f32 1.0, %v1103_v54  ;;  %v1056_v19 = vsel %vm1055_vm5, %v2322_v5, %v1054_v59  ;;  %1343 = vrsqrt.f32 %v2410_v45  ;;  %vm1013_vm14 = vcmp.eq.f32.partialorder %v2397_v4, inf }
 0x1d1   :  { %v1118_v38 = vadd.f32 1.0, %v1102_v55  ;;  %v1059_v36 = vsel %vm1057_vm6, %v1058_v21, %v1056_v19  ;;  %v1049_v37 = vsel %vm1048_vm3, %v2324_v52, %v1047_v23  ;;  %v1016_v7 = vand.u32 2147483648, %v2397_v4  ;;  %v665_v19 = vld [vmem:[#allocation2 + $0x78] sm:$0xff]  ;;  %v664_v23 = vld [vmem:[#allocation2 + $0x70] sm:$0xff] }
 0x1d2   :  { %v1135_v0 = vmax.f32 %v1119_v12, 0.0  ;;  %v1052_v42 = vsel %vm1050_vm9, %v1051_v39, %v1049_v37  ;;  %vm927_vm5 = vcmp.eq.f32.partialorder %v2389_v61, 0.0  ;;  %vm1006_vm6 = vcmp.eq.f32.partialorder %v2410_v45, inf  ;;  %vm2939_vm9 = vmmov %vm2938_vm2 }
 0x1d3   :  { %v1134_v30 = vmax.f32 %v1118_v38, 0.0  ;;  %v1110_v2 = vsub.f32 %v908_v40, %v1052_v42  ;;  %vm1008_vm3 = vcmp.eq.f32.partialorder %v2410_v45, 0.0  ;;  %v1009_v54 = vand.u32 2147483648, %v2410_v45  ;;  %v656_v38 = vld [vmem:[#allocation2 + $0x30] sm:$0xff] }
 0x1d4   :  { %v768_v26 = vpop.xlane.xlu0 %767  ;;  %1151 = vst.msk [vmem:[%s2767_s4 + $0x8] sm:$0xff] %vm2935_vm10, %v1135_v0 }
 0x1d5   :  { %v770_v31 = vpop.xlane.xlu1 %769  ;;  %v789_v49 = vmin.f32 %v741_v18, %v768_v26  ;;  %v1111_v18 = vsub.f32 %v2359_v57, %v1059_v36  ;;  %1150 = vst.msk [vmem:[%s2767_s4] sm:$0xff] %vm2936_vm7, %v1134_v30  ;;  %v872_v26 = vand.u32 2147483648, %v2349_v28  ;;  %v1126_v57 = vadd.f32 1.0, %v1110_v2  ;;  %vm2941_vm7 = vmmov %vm2938_vm2 }
 0x1d6   :  { %v790_v48 = vmin.f32 %v742_v25, %v770_v31  ;;  %v1334_v25 = vpop.eup %1333 }
 0x1d7   :  { %805 = vst.msk [vmem:[#allocation3 + $0x50] sm:$0xff] %vm2934_vm4, %v789_v49  ;;  %v1336_v41 = vpop.eup %1335  ;;  %v868_v31 = vmul.f32 %v1334_v25, %v2349_v28  ;;  %v1127_v43 = vadd.f32 1.0, %v1111_v18  ;;  %v1142_v56 = vmax.f32 %v1126_v57, 0.0  ;;  %vm1015_vm4 = vcmp.eq.f32.partialorder %v2397_v4, 0.0 }
 0x1d8   :  { %806 = vst.msk [vmem:[#allocation3 + $0x58] sm:$0xff] %vm2933_vm11, %v790_v48  ;;  %v861_v33 = vmul.f32 %v1336_v41, %v2351_v10  ;;  %v1338_v34 = vpop.eup %1337  ;;  %vm918_vm11 = vcmp.eq.f32.partialorder %v2391_v53, inf }
 0x1d9   :  { %v1143_v15 = vmax.f32 %v1127_v43, 0.0  ;;  %v870_v60 = vsel %vm869_vm12, %v2349_v28, %v868_v31  ;;  %v1340_v14 = vpop.eup %1339  ;;  %1158 = vst.msk [vmem:[%s2767_s4 + $0x40] sm:$0xff] %vm2939_vm9, %v1142_v56  ;;  %v924_v39 = vmul.f32 %v1338_v34, %v2389_v61  ;;  %vm920_vm12 = vcmp.eq.f32.partialorder %v2391_v53, 0.0  ;;  %v738_v43 = vld [vmem:[#allocation3 + $0x38] sm:$0xff] }
 0x1da   :  { %v863_v17 = vsel %vm862_vm1, %v2351_v10, %v861_v33  ;;  %v2484_v32 = vsel %vm871_vm15, %v872_v26, %v870_v60  ;;  %v1342_v55 = vpop.eup %1341  ;;  %vm2940_vm15 = vmmov %vm2938_vm2 }
 0x1db   :  { %v2367_v16 = vpop.xlane.xlu0 %674  ;;  %1159 = vst.msk [vmem:[%s2767_s4 + $0x48] sm:$0xff] %vm2938_vm2, %v1143_v15  ;;  %v2496_v28 = vsel %vm864_vm0, %v865_v47, %v863_v17  ;;  %v1012_v0 = vmul.f32 %v1342_v55, %v2397_v4  ;;  %v1344_v40 = vpop.eup %1343  ;;  %vm2942_vm1 = vmmov %vm2938_vm2  ;;  %v926_v42 = vsel %vm925_vm13, %v2389_v61, %v924_v39 }
 0x1dc   :  { %v1005_v18 = vmul.f32 %v1344_v40, %v2410_v45  ;;  %vm2943_vm0 = vmmov %vm2942_vm1 }
 0x1dd   :  { %v2365_v11 = vpop.xlane.xlu1 %676  ;;  %vm2944_vm2 = vmmov %vm2943_vm0 }
 0x1de   :  { %v968_v5 = vld [vmem:[#allocation3 + $0x50] sm:$0xff]  ;;  %v703_v49 = vmax.f32 %v655_v62, %v2365_v11  ;;  %v654_v11 = vld [vmem:[#allocation2 + $0x20] sm:$0xff]  ;;  %vm2945_vm9 = vmmov %vm2943_vm0 }
 0x1df   :  { %v2401_v63 = vpop.xlane.xlu0 %690  ;;  %v969_v27 = vld [vmem:[#allocation3 + $0x58] sm:$0xff]  ;;  %v2459_v48 = vmax.f32 %v968_v5, 0.0  ;;  %v702_v21 = vmax.f32 %v654_v11, %v2367_v16  ;;  %v917_v16 = vmul.f32 %v1340_v14, %v2391_v53  ;;  %v929_v11 = vsel %vm927_vm5, %v928_v3, %v926_v42  ;;  %vm2951_vm5 = vmmov %vm2943_vm0 }
 0x1e0   :  { %v2457_v52 = vmax.f32 %v969_v27, 0.0  ;;  %720 = vst.msk [vmem:[#allocation2 + $0x28] sm:$0xff] %vm2937_vm8, %v703_v49  ;;  %v710_v59 = vmax.f32 %v662_v51, %v2401_v63 }
 0x1e1   :  { %v2399_v22 = vpop.xlane.xlu1 %692  ;;  %719 = vst.msk [vmem:[#allocation2 + $0x20] sm:$0xff] %vm2940_vm15, %v702_v21  ;;  %vm2946_vm15 = vmmov %vm2943_vm0  ;;  %vm1062_vm13 = vcmp.eq.f32.partialorder %v2459_v48, inf  ;;  %v919_v15 = vsel %vm918_vm11, %v2391_v53, %v917_v16  ;;  %v1065_v60 = vand.u32 2147483648, %v2459_v48 }
 0x1e2   :  { %1345 = vrsqrt.f32 %v2457_v52  ;;  %v711_v12 = vmax.f32 %v663_v50, %v2399_v22  ;;  %vm1069_vm10 = vcmp.eq.f32.partialorder %v2457_v52, inf  ;;  %727 = vst.msk [vmem:[#allocation2 + $0x60] sm:$0xff] %vm2942_vm1, %v710_v59  ;;  %vm1071_vm8 = vcmp.eq.f32.partialorder %v2457_v52, 0.0  ;;  %vm2949_vm1 = vmmov %vm2943_vm0 }
 0x1e3   :  { %1347 = vrsqrt.f32 %v2459_v48  ;;  %v1072_v33 = vand.u32 2147483648, %v2457_v52  ;;  %vm2950_vm11 = vmmov %vm2943_vm0 }
 0x1e4   :  { %728 = vst.msk [vmem:[#allocation2 + $0x68] sm:$0xff] %vm2941_vm7, %v711_v12  ;;  %vm1064_vm7 = vcmp.eq.f32.partialorder %v2459_v48, 0.0 }
 0x1e7   :  { %v2422_v24 = vpop.xlane.xlu0 %755 }
 0x1e8   :  { %v2420_v6 = vpop.xlane.xlu1 %757  ;;  %v783_v22 = vmin.f32 %v735_v58, %v2422_v24  ;;  %v819_v24 = vld [vmem:[#allocation2 + $0x28] sm:$0xff] }
 0x1e9   :  { %v784_v10 = vmin.f32 %v736_v9, %v2420_v6  ;;  %v1014_v6 = vsel %vm1013_vm14, %v2397_v4, %v1012_v0  ;;  %v1007_v4 = vsel %vm1006_vm6, %v2410_v45, %v1005_v18  ;;  %v2531_v26 = vmax.f32 %v819_v24, 0.0  ;;  %vm2947_vm14 = vmmov %vm2943_vm0  ;;  %v818_v9 = vld [vmem:[#allocation2 + $0x20] sm:$0xff] }
 0x1ea   :  { %v1017_v5 = vsel %vm1015_vm4, %v1016_v7, %v1014_v6  ;;  %799 = vst.msk [vmem:[#allocation3 + $0x20] sm:$0xff] %vm2944_vm2, %v783_v22  ;;  %vm2948_vm4 = vmmov %vm2943_vm0  ;;  %v1010_v2 = vsel %vm1008_vm3, %v1009_v54, %v1007_v4  ;;  %v2561_v3 = vmax.f32 %v818_v9, 0.0 }
 0x1eb   :  { %800 = vst.msk [vmem:[#allocation3 + $0x28] sm:$0xff] %vm2943_vm0, %v784_v10  ;;  %v1105_v31 = vsub.f32 %v2484_v32, %v1017_v5  ;;  %v1104_v57 = vsub.f32 %v2496_v28, %v1010_v2  ;;  %1349 = vrsqrt.f32 %v2531_v26  ;;  %v922_v32 = vsel %vm920_vm12, %v921_v13, %v919_v15  ;;  %vm2952_vm6 = vmmov %vm2943_vm0 }
 0x1ec   :  { %v1346_v49 = vpop.eup %1345  ;;  %1351 = vrsqrt.f32 %v2561_v3  ;;  %vm2953_vm3 = vmmov %vm2943_vm0  ;;  %vm885_vm2 = vcmp.eq.f32.partialorder %v2531_v26, 0.0  ;;  %v879_v18 = vand.u32 2147483648, %v2561_v3 }
 0x1ed   :  { %v1121_v45 = vadd.f32 1.0, %v1105_v31  ;;  %v1348_v17 = vpop.eup %1347  ;;  %v1068_v50 = vmul.f32 %v1346_v49, %v2457_v52  ;;  %v1120_v56 = vadd.f32 1.0, %v1104_v57  ;;  %vm2954_vm12 = vmmov %vm2943_vm0 }
 0x1ee   :  { %v2454_v46 = vpop.xlane.xlu0 %771  ;;  %v1061_v7 = vmul.f32 %v1348_v17, %v2459_v48 }
 0x1ef   :  { %v2452_v44 = vpop.xlane.xlu1 %773  ;;  %v791_v30 = vmin.f32 %v743_v35, %v2454_v46  ;;  %v737_v46 = vld [vmem:[#allocation3 + $0x30] sm:$0xff]  ;;  %v1137_v34 = vmax.f32 %v1121_v45, 0.0  ;;  %v1070_v61 = vsel %vm1069_vm10, %v2457_v52, %v1068_v50  ;;  %vm2955_vm10 = vmmov %vm2943_vm0 }
 0x1f0   :  { %v792_v63 = vmin.f32 %v744_v20, %v2452_v44  ;;  %v1136_v20 = vmax.f32 %v1120_v56, 0.0  ;;  %v1073_v53 = vsel %vm1071_vm8, %v1072_v33, %v1070_v61  ;;  %v1063_v13 = vsel %vm1062_vm13, %v2459_v48, %v1061_v7 }
 0x1f1   :  { %807 = vst.msk [vmem:[#allocation3 + $0x60] sm:$0xff] %vm2946_vm15, %v791_v30  ;;  %v1113_v55 = vsub.f32 %v929_v11, %v1073_v53  ;;  %v1066_v28 = vsel %vm1064_vm7, %v1065_v60, %v1063_v13  ;;  %v962_v59 = vld [vmem:[#allocation3 + $0x20] sm:$0xff]  ;;  %vm883_vm8 = vcmp.eq.f32.partialorder %v2531_v26, inf  ;;  %vm878_vm15 = vcmp.eq.f32.partialorder %v2561_v3, 0.0 }
 0x1f2   :  { %808 = vst.msk [vmem:[#allocation3 + $0x68] sm:$0xff] %vm2945_vm9, %v792_v63  ;;  %v963_v58 = vld [vmem:[#allocation3 + $0x28] sm:$0xff]  ;;  %v1112_v52 = vsub.f32 %v922_v32, %v1066_v28  ;;  %v2590_v10 = vmax.f32 %v962_v59, 0.0  ;;  %vm876_vm9 = vcmp.eq.f32.partialorder %v2561_v3, inf }
 0x1f3   :  { %1153 = vst.msk [vmem:[%s2767_s4 + $0x18] sm:$0xff] %vm2951_vm5, %v1137_v34  ;;  %v2581_v21 = vmax.f32 %v963_v58, 0.0  ;;  %v1129_v12 = vadd.f32 1.0, %v1113_v55 }
 0x1f4   :  { %1152 = vst.msk [vmem:[%s2767_s4 + $0x10] sm:$0xff] %vm2953_vm3, %v1136_v20  ;;  %vm1022_vm5 = vcmp.eq.f32.partialorder %v2590_v10, 0.0 }
 0x1f5   :  { %v679_v29 = vpop.xlane.xlu0 %678  ;;  %v1145_v39 = vmax.f32 %v1129_v12, 0.0  ;;  %vm1027_vm7 = vcmp.eq.f32.partialorder %v2581_v21, inf  ;;  %v1030_v31 = vand.u32 2147483648, %v2581_v21 }
 0x1f6   :  { %v704_v27 = vmax.f32 %v656_v38, %v679_v29  ;;  %v826_v29 = vld [vmem:[#allocation2 + $0x60] sm:$0xff] }
 0x1f7   :  { %v681_v8 = vpop.xlane.xlu1 %680  ;;  %v2575_v35 = vmax.f32 %v826_v29, 0.0  ;;  %1161 = vst.msk [vmem:[%s2767_s4 + $0x58] sm:$0xff] %vm2954_vm12, %v1145_v39 }
 0x1f8   :  { %v705_v37 = vmax.f32 %v657_v1, %v681_v8  ;;  %721 = vst.msk [vmem:[#allocation2 + $0x30] sm:$0xff] %vm2948_vm4, %v704_v27  ;;  %v827_v8 = vld [vmem:[#allocation2 + $0x68] sm:$0xff]  ;;  %v1128_v1 = vadd.f32 1.0, %v1112_v52  ;;  %v970_v48 = vld [vmem:[#allocation3 + $0x60] sm:$0xff] }
 0x1f9   :  { %v695_v25 = vpop.xlane.xlu0 %694  ;;  %v2563_v54 = vmax.f32 %v827_v8, 0.0  ;;  %v971_v38 = vld [vmem:[#allocation3 + $0x68] sm:$0xff]  ;;  %v2598_v16 = vmax.f32 %v970_v48, 0.0  ;;  %vm932_vm4 = vcmp.eq.f32.partialorder %v2575_v35, inf  ;;  %v935_v24 = vand.u32 2147483648, %v2575_v35 }
 0x1fa   :  { %v712_v41 = vmax.f32 %v664_v23, %v695_v25  ;;  %722 = vst.msk [vmem:[#allocation2 + $0x38] sm:$0xff] %vm2947_vm14, %v705_v37  ;;  %v1144_v0 = vmax.f32 %v1128_v1, 0.0  ;;  %v1350_v23 = vpop.eup %1349  ;;  %v2596_v40 = vmax.f32 %v971_v38, 0.0  ;;  %v886_v25 = vand.u32 2147483648, %v2531_v26  ;;  %v746_v38 = vld [vmem:[#allocation3 + $0x78] sm:$0xff] }
 0x1fb   :  { %v697_v36 = vpop.xlane.xlu1 %696  ;;  %1353 = vrsqrt.f32 %v2563_v54  ;;  %v882_v63 = vmul.f32 %v1350_v23, %v2531_v26  ;;  %vm939_vm14 = vcmp.eq.f32.partialorder %v2563_v54, inf  ;;  %v942_v37 = vand.u32 2147483648, %v2563_v54 }
 0x1fc   :  { %v713_v62 = vmax.f32 %v665_v19, %v697_v36  ;;  %729 = vst.msk [vmem:[#allocation2 + $0x70] sm:$0xff] %vm2943_vm0, %v712_v41  ;;  %1355 = vrsqrt.f32 %v2575_v35  ;;  %v1352_v36 = vpop.eup %1351  ;;  %vm941_vm13 = vcmp.eq.f32.partialorder %v2563_v54, 0.0  ;;  %vm934_vm0 = vcmp.eq.f32.partialorder %v2575_v35, 0.0 }
 0x1fd   :  { %1357 = vrsqrt.f32 %v2581_v21  ;;  %1160 = vst.msk [vmem:[%s2767_s4 + $0x50] sm:$0xff] %vm2955_vm10, %v1144_v0  ;;  %v875_v5 = vmul.f32 %v1352_v36, %v2561_v3  ;;  %v884_v42 = vsel %vm883_vm8, %v2531_v26, %v882_v63  ;;  %vm1085_vm3 = vcmp.eq.f32.partialorder %v2596_v40, 0.0 }
 0x1fe   :  { %730 = vst.msk [vmem:[#allocation2 + $0x78] sm:$0xff] %vm2949_vm1, %v713_v62  ;;  %1359 = vrsqrt.f32 %v2590_v10  ;;  %vm1029_vm1 = vcmp.eq.f32.partialorder %v2581_v21, 0.0  ;;  %v1086_v57 = vand.u32 2147483648, %v2596_v40  ;;  %vm1076_vm12 = vcmp.eq.f32.partialorder %v2598_v16, inf }
 0x1ff   :  { %1361 = vrsqrt.f32 %v2596_v40  ;;  %v820_v30 = vld [vmem:[#allocation2 + $0x30] sm:$0xff]  ;;  %vm1078_vm10 = vcmp.eq.f32.partialorder %v2598_v16, 0.0  ;;  %v1079_v9 = vand.u32 2147483648, %v2598_v16  ;;  %vm2956_vm8 = vcmask 7168  }
 0x200   :  { %v760_v47 = vpop.xlane.xlu0 %759  ;;  %1363 = vrsqrt.f32 %v2598_v16  ;;  %v2623_v62 = vmax.f32 %v820_v30, 0.0 }
 0x201   :  { %v762_v44 = vpop.xlane.xlu1 %761  ;;  %v785_v14 = vmin.f32 %v737_v46, %v760_v47  ;;  %v821_v19 = vld [vmem:[#allocation2 + $0x38] sm:$0xff]  ;;  %v887_v46 = vsel %vm885_vm2, %v886_v25, %v884_v42  ;;  %v877_v47 = vsel %vm876_vm9, %v2561_v3, %v875_v5  ;;  %vm2957_vm2 = vmmov %vm2956_vm8 }
 0x202   :  { %v786_v51 = vmin.f32 %v738_v43, %v762_v44  ;;  %v2606_v22 = vmax.f32 %v821_v19, 0.0  ;;  %v1023_v44 = vand.u32 2147483648, %v2590_v10  ;;  %v880_v34 = vsel %vm878_vm15, %v879_v18, %v877_v47  ;;  %vm2958_vm15 = vmmov %vm2957_vm2 }
 0x203   :  { %801 = vst.msk [vmem:[#allocation3 + $0x30] sm:$0xff] %vm2952_vm6, %v785_v14  ;;  %vm1083_vm6 = vcmp.eq.f32.partialorder %v2596_v40, inf  ;;  %v828_v30 = vld [vmem:[#allocation2 + $0x70] sm:$0xff] }
 0x204   :  { %802 = vst.msk [vmem:[#allocation3 + $0x38] sm:$0xff] %vm2950_vm11, %v786_v51  ;;  %1365 = vrsqrt.f32 %v2606_v22  ;;  %vm1020_vm11 = vcmp.eq.f32.partialorder %v2590_v10, inf  ;;  %vm897_vm9 = vcmp.eq.f32.partialorder %v2606_v22, inf  ;;  %v2716_v42 = vmax.f32 %v828_v30, 0.0 }
 0x205   :  { %v1354_v6 = vpop.eup %1353  ;;  %1367 = vrsqrt.f32 %v2623_v62  ;;  %v829_v63 = vld [vmem:[#allocation2 + $0x78] sm:$0xff] }
 0x206   :  { %v1356_v41 = vpop.eup %1355  ;;  %v938_v43 = vmul.f32 %v1354_v6, %v2563_v54  ;;  %v778_v48 = vpop.xlane.xlu1 %777  ;;  %v2707_v5 = vmax.f32 %v829_v63, 0.0 }
 0x207   :  { %v1358_v4 = vpop.eup %1357  ;;  %v931_v49 = vmul.f32 %v1356_v41, %v2575_v35  ;;  %v794_v36 = vmin.f32 %v746_v38, %v778_v48  ;;  %v900_v41 = vand.u32 2147483648, %v2606_v22 }
 0x208   :  { %v1026_v33 = vmul.f32 %v1358_v4, %v2581_v21  ;;  %v1360_v15 = vpop.eup %1359  ;;  %v940_v17 = vsel %vm939_vm14, %v2563_v54, %v938_v43  ;;  %vm2959_vm14 = vmmov %vm2957_vm2 }
 0x209   :  { %v1362_v60 = vpop.eup %1361  ;;  %v1019_v50 = vmul.f32 %v1360_v15, %v2590_v10  ;;  %v933_v8 = vsel %vm932_vm4, %v2575_v35, %v931_v49  ;;  %v943_v61 = vsel %vm941_vm13, %v942_v37, %v940_v17  ;;  %v776_v35 = vpop.xlane.xlu0 %775  ;;  %810 = vst.msk [vmem:[#allocation3 + $0x78] sm:$0xff] %vm2959_vm14, %v794_v36  ;;  %vm2960_vm4 = vmmov %vm2957_vm2  ;;  %v893_v15 = vand.u32 2147483648, %v2623_v62 }
 0x20a   :  { %v1028_v45 = vsel %vm1027_vm7, %v2581_v21, %v1026_v33  ;;  %v964_v26 = vld [vmem:[#allocation3 + $0x30] sm:$0xff]  ;;  %v1364_v51 = vpop.eup %1363  ;;  %v1082_v7 = vmul.f32 %v1362_v60, %v2596_v40  ;;  %v936_v54 = vsel %vm934_vm0, %v935_v24, %v933_v8  ;;  %vm2961_vm7 = vmmov %vm2957_vm2 }
 0x20b   :  { %v965_v27 = vld [vmem:[#allocation3 + $0x38] sm:$0xff]  ;;  %v1031_v11 = vsel %vm1029_vm1, %v1030_v31, %v1028_v45  ;;  %v1021_v29 = vsel %vm1020_vm11, %v2590_v10, %v1019_v50  ;;  %v1075_v14 = vmul.f32 %v1364_v51, %v2598_v16  ;;  %v2672_v32 = vmax.f32 %v964_v26, 0.0  ;;  %v745_v10 = vld [vmem:[#allocation3 + $0x70] sm:$0xff] }
 0x20c   :  { %v2635_v2 = vmax.f32 %v965_v27, 0.0  ;;  %v1107_v56 = vsub.f32 %v887_v46, %v1031_v11  ;;  %v1024_v58 = vsel %vm1022_vm5, %v1023_v44, %v1021_v29  ;;  %v1084_v20 = vsel %vm1083_vm6, %v2596_v40, %v1082_v7 }
 0x20d   :  { %v1106_v13 = vsub.f32 %v880_v34, %v1024_v58  ;;  %v1087_v55 = vsel %vm1085_vm3, %v1086_v57, %v1084_v20  ;;  %v1077_v28 = vsel %vm1076_vm12, %v2598_v16, %v1075_v14  ;;  %v793_v18 = vmin.f32 %v745_v10, %v776_v35  ;;  %vm2962_vm12 = vmmov %vm2957_vm2 }
 0x20e   :  { %1369 = vrsqrt.f32 %v2635_v2  ;;  %v1123_v3 = vadd.f32 1.0, %v1107_v56  ;;  %v1366_v53 = vpop.eup %1365  ;;  %v1115_v52 = vsub.f32 %v943_v61, %v1087_v55  ;;  %v1080_v12 = vsel %vm1078_vm10, %v1079_v9, %v1077_v28  ;;  %vm2963_vm10 = vmmov %vm2957_vm2 }
 0x20f   :  { %1371 = vrsqrt.f32 %v2672_v32  ;;  %v1122_v59 = vadd.f32 1.0, %v1106_v13  ;;  %v1114_v1 = vsub.f32 %v936_v54, %v1080_v12  ;;  %v896_v0 = vmul.f32 %v1366_v53, %v2606_v22  ;;  %v1368_v19 = vpop.eup %1367  ;;  %809 = vst.msk [vmem:[#allocation3 + $0x70] sm:$0xff] %vm2961_vm7, %v793_v18 }
 0x210   :  { %v1139_v21 = vmax.f32 %v1123_v3, 0.0  ;;  %v1131_v39 = vadd.f32 1.0, %v1115_v52  ;;  %v889_v27 = vmul.f32 %v1368_v19, %v2623_v62  ;;  %vm1041_vm13 = vcmp.eq.f32.partialorder %v2635_v2, inf  ;;  %v973_v60 = vld [vmem:[#allocation3 + $0x78] sm:$0xff] }
 0x211   :  { %v1138_v23 = vmax.f32 %v1122_v59, 0.0  ;;  %v1130_v40 = vadd.f32 1.0, %v1114_v1  ;;  %v898_v37 = vsel %vm897_vm9, %v2606_v22, %v896_v0  ;;  %v1044_v31 = vand.u32 2147483648, %v2635_v2 }
 0x212   :  { %1155 = vst.msk [vmem:[%s2767_s4 + $0x28] sm:$0xff] %vm2956_vm8, %v1139_v21  ;;  %v1147_v16 = vmax.f32 %v1131_v39, 0.0  ;;  %vm899_vm1 = vcmp.eq.f32.partialorder %v2606_v22, 0.0  ;;  %vm1043_vm0 = vcmp.eq.f32.partialorder %v2635_v2, 0.0  ;;  %vm890_vm11 = vcmp.eq.f32.partialorder %v2623_v62, inf }
 0x213   :  { %1154 = vst.msk [vmem:[%s2767_s4 + $0x20] sm:$0xff] %vm2957_vm2, %v1138_v23  ;;  %v1146_v6 = vmax.f32 %v1130_v40, 0.0  ;;  %v901_v33 = vsel %vm899_vm1, %v900_v41, %v898_v37  ;;  %v891_v46 = vsel %vm890_vm11, %v2623_v62, %v889_v27  ;;  %1373 = vrsqrt.f32 %v2707_v5  ;;  %vm2964_vm1 = vmmov %vm2963_vm10 }
 0x214   :  { %1163 = vst.msk [vmem:[%s2767_s4 + $0x68] sm:$0xff] %vm2958_vm15, %v1147_v16  ;;  %1375 = vrsqrt.f32 %v2716_v42  ;;  %vm1034_vm5 = vcmp.eq.f32.partialorder %v2672_v32, inf  ;;  %v1037_v22 = vand.u32 2147483648, %v2672_v32  ;;  %vm892_vm6 = vcmp.eq.f32.partialorder %v2623_v62, 0.0 }
 0x215   :  { %1162 = vst.msk [vmem:[%s2767_s4 + $0x60] sm:$0xff] %vm2960_vm4, %v1146_v6  ;;  %vm1036_vm3 = vcmp.eq.f32.partialorder %v2672_v32, 0.0  ;;  %v894_v57 = vsel %vm892_vm6, %v893_v15, %v891_v46  ;;  %v989_v50 = vmax.f32 %v973_v60, 0.0  ;;  %vm953_vm8 = vcmp.eq.f32.partialorder %v2707_v5, inf }
 0x216   :  { %v972_v51 = vld [vmem:[#allocation3 + $0x70] sm:$0xff]  ;;  %vm955_vm2 = vcmp.eq.f32.partialorder %v2707_v5, 0.0  ;;  %vm946_vm9 = vcmp.eq.f32.partialorder %v2716_v42, inf  ;;  %vm948_vm15 = vcmp.eq.f32.partialorder %v2716_v42, 0.0  ;;  %v949_v58 = vand.u32 2147483648, %v2716_v42 }
 0x217   :  { %v988_v34 = vmax.f32 %v972_v51, 0.0  ;;  %1377 = vrsqrt.f32 %v989_v50  ;;  %vm1097_vm14 = vcmp.eq.f32.partialorder %v989_v50, inf  ;;  %v1100_v13 = vand.u32 2147483648, %v989_v50 }
 0x218   :  { %v1370_v25 = vpop.eup %1369  ;;  %vm1099_vm4 = vcmp.eq.f32.partialorder %v989_v50, 0.0 }
 0x219   :  { %v1040_v24 = vmul.f32 %v1370_v25, %v2635_v2  ;;  %v1372_v43 = vpop.eup %1371  ;;  %1379 = vrsqrt.f32 %v988_v34  ;;  %v1093_v54 = vand.u32 2147483648, %v988_v34  ;;  %vm1092_vm7 = vcmp.eq.f32.partialorder %v988_v34, 0.0 }
 0x21a   :  { %v1033_v49 = vmul.f32 %v1372_v43, %v2672_v32 }
 0x21b   :  { %v1042_v4 = vsel %vm1041_vm13, %v2635_v2, %v1040_v24  ;;  %vm1090_vm13 = vcmp.eq.f32.partialorder %v988_v34, inf }
 0x21c   :  { %v1045_v44 = vsel %vm1043_vm0, %v1044_v31, %v1042_v4  ;;  %v1035_v45 = vsel %vm1034_vm5, %v2672_v32, %v1033_v49  ;;  %v956_v32 = vand.u32 2147483648, %v2707_v5  ;;  %vm2965_vm0 = vmmov %vm2964_vm1 }
 0x21d   :  { %v1109_v47 = vsub.f32 %v901_v33, %v1045_v44  ;;  %v1038_v26 = vsel %vm1036_vm3, %v1037_v22, %v1035_v45  ;;  %v1374_v7 = vpop.eup %1373 }
 0x21e   :  { %v1108_v11 = vsub.f32 %v894_v57, %v1038_v26  ;;  %v1376_v9 = vpop.eup %1375  ;;  %v952_v8 = vmul.f32 %v1374_v7, %v2707_v5 }
 0x21f   :  { %v1125_v2 = vadd.f32 1.0, %v1109_v47  ;;  %v945_v29 = vmul.f32 %v1376_v9, %v2716_v42 }
 0x220   :  { %v1124_v56 = vadd.f32 1.0, %v1108_v11  ;;  %v954_v3 = vsel %vm953_vm8, %v2707_v5, %v952_v8 }
 0x221   :  { %v1141_v17 = vmax.f32 %v1125_v2, 0.0  ;;  %v1378_v14 = vpop.eup %1377  ;;  %v947_v53 = vsel %vm946_vm9, %v2716_v42, %v945_v29  ;;  %v957_v21 = vsel %vm955_vm2, %v956_v32, %v954_v3 }
 0x222   :  { %v1140_v62 = vmax.f32 %v1124_v56, 0.0  ;;  %v1096_v20 = vmul.f32 %v1378_v14, %v989_v50  ;;  %v950_v59 = vsel %vm948_vm15, %v949_v58, %v947_v53 }
 0x223   :  { %1157 = vst.msk [vmem:[%s2767_s4 + $0x38] sm:$0xff] %vm2962_vm12, %v1141_v17  ;;  %v1380_v61 = vpop.eup %1379 }
 0x224   :  { %1156 = vst.msk [vmem:[%s2767_s4 + $0x30] sm:$0xff] %vm2963_vm10, %v1140_v62  ;;  %v1089_v55 = vmul.f32 %v1380_v61, %v988_v34  ;;  %v1098_v28 = vsel %vm1097_vm14, %v989_v50, %v1096_v20 }
 0x225   :  { %v1101_v52 = vsel %vm1099_vm4, %v1100_v13, %v1098_v28 }
 0x226   :  { %v1091_v12 = vsel %vm1090_vm13, %v988_v34, %v1089_v55  ;;  %v1117_v1 = vsub.f32 %v957_v21, %v1101_v52 }
 0x227   :  { %v1094_v38 = vsel %vm1092_vm7, %v1093_v54, %v1091_v12 }
 0x228   :  { %v1116_v48 = vsub.f32 %v950_v59, %v1094_v38  ;;  %v1133_v39 = vadd.f32 1.0, %v1117_v1 }
 0x22a   :  { %v1132_v0 = vadd.f32 1.0, %v1116_v48  ;;  %v1149_v10 = vmax.f32 %v1133_v39, 0.0 }
 0x22c   :  { %v1148_v35 = vmax.f32 %v1132_v0, 0.0  ;;  %1165 = vst.msk [vmem:[%s2767_s4 + $0x78] sm:$0xff] %vm2964_vm1, %v1149_v10 }
 0x22e   :  { %1164 = vst.msk [vmem:[%s2767_s4 + $0x70] sm:$0xff] %vm2965_vm0, %v1148_v35 }

</bundles_post_ra>
